<compile_context>
chip_gen: v7x
topology: tpu7x:2x2x1
jax: 0.10.0
libtpu: 0.0.40
codegen_flags: <defaults>
</compile_context>

<pallas_src>
import functools

import jax
import jax.numpy as jnp
from jax.experimental import pallas as pl
from jax.experimental.pallas import tpu as pltpu


# ----------------------------- Pallas kernels ------------------------------

def _conv_matmul_kernel(p_ref, w_ref, b_ref, z_ref):
    # conv for ALL time steps as one im2col matmul (block-diag weight) + bias
    z_ref[...] = jnp.dot(p_ref[...], w_ref[...],
                         preferred_element_type=jnp.float32) + b_ref[...]


def _recurrence_kernel(z_ref, wfc_ref, bfc_ref, out_ref,
                       v_conv, v_fc, s_scr, *, inv_tau, hwc, c_step, h_step):
    t = pl.program_id(0)

    @pl.when(t == 0)
    def _init():
        v_conv[...] = jnp.zeros_like(v_conv)
        v_fc[...] = jnp.zeros_like(v_fc)
        s_scr[...] = jnp.zeros_like(s_scr)     # also zeros the pooling pad tail
        out_ref[...] = jnp.zeros_like(out_ref)

    # ---- conv-layer LIF (charge, fire, hard reset) ----
    z = z_ref[0]                               # (B, H*W*Cout), bias already added
    v = v_conv[...]
    v_new = v + (z - v) * inv_tau
    fired = v_new >= 1.0
    v_conv[...] = jnp.where(fired, 0.0, v_new)
    s_scr[:, 0:hwc] = fired.astype(jnp.float32)

    # ---- 2x2 stride-2 max pool: max of 4 statically shifted windows of the
    #      zero-padded spike scratch.  Only lanes at (even h, even w) carry the
    #      pooled value; the others multiply zero rows of the FC weight. ----
    m = jnp.maximum(
        jnp.maximum(s_scr[:, 0:hwc],
                    s_scr[:, c_step:hwc + c_step]),
        jnp.maximum(s_scr[:, h_step:hwc + h_step],
                    s_scr[:, h_step + c_step:hwc + h_step + c_step]))

    # ---- FC matmul (MXU, weights resident in VMEM) + LIF ----
    zfc = jnp.dot(m, wfc_ref[...], preferred_element_type=jnp.float32) + bfc_ref[...]
    vf = v_fc[...]
    vf_new = vf + (zfc - vf) * inv_tau
    ffc = vf_new >= 1.0
    v_fc[...] = jnp.where(ffc, 0.0, vf_new)
    out_ref[...] += ffc.astype(jnp.float32)


# ------------------------------ wrapper (glue) ------------------------------

def network_forward(params, x_nchw, labels, key, *, spike_window, tau):
    """Forward of NetworkBuilder('CONVS_8_3_1_1_FCS_10', train_mode='BP').

    x_nchw: (B, Cin, H, W) float32 in [0, 1].  labels unused in 'BP' mode.
    Returns out_fr = mean over spike_window of output-layer LIF spikes, (B, Fout).
    """
    del labels  # TrainingHook is identity in 'BP' mode
    wconv, bconv, wfc, bfc = (params["wconv"], params["bconv"],
                              params["wfc"], params["bfc"])
    B, Cin, H, W = x_nchw.shape
    Cout, _, KH, KW = wconv.shape
    Hp, Wp = H // 2, W // 2
    Fout = wfc.shape[0]
    T = spike_window
    KKC = KH * KW * Cin
    HWC = H * W * Cout
    FOUT_PAD = 128          # pad FC output lanes to a full lane tile

    # ---------- one-time parameter re-layout (outside the hot path) ----------
    # conv weight as im2col matrix, rows (kh, kw, cin) x cols cout
    wmat = jnp.transpose(wconv, (2, 3, 1, 0)).reshape(KKC, Cout)
    # block-diagonal replication over the W output columns -> conv matmul emits
    # the lane-dense (t,b,h) x (w*Cout + c) layout directly
    w2 = jnp.einsum("ij,kc->ikjc", jnp.eye(W, dtype=wmat.dtype),
                    wmat).reshape(W * KKC, W * Cout)
    bconv_row = jnp.tile(bconv, W).reshape(1, W * Cout)

    # FC weight scattered onto the un-compacted (h, w, c) pooled layout:
    # nonzero only at even (h, w); zero rows kill the un-pooled garbage lanes.
    wfc_r = jnp.transpose(wfc.reshape(Fout, Cout, Hp, Wp), (2, 3, 1, 0))  # (hp,wp,c,o)
    wfc_big = jnp.zeros((H, W, Cout, Fout), wfc.dtype).at[0::2, 0::2, :, :].set(wfc_r)
    wfc_big = jnp.pad(wfc_big.reshape(HWC, Fout), ((0, 0), (0, FOUT_PAD - Fout)))
    bfc_row = jnp.pad(bfc, (0, FOUT_PAD - Fout)).reshape(1, FOUT_PAD)

    # ---------- Poisson encoding for ALL steps at once (state independent) ----------
    x = jnp.transpose(x_nchw, (0, 2, 3, 1)).astype(jnp.float32)  # NCHW -> NHWC
    u = jax.random.uniform(key, (T, B, H, W, Cin), jnp.float32)
    spikes = (u <= x[None]).astype(jnp.float32)

    # one-time im2col over all steps; patch cols ordered (w, kh, kw, cin)
    spad = jnp.pad(spikes, ((0, 0), (0, 0), (1, 1), (1, 1), (0, 0)))
    wins = [spad[:, :, kh:kh + H, kw:kw + W, :]
            for kh in range(KH) for kw in range(KW)]
    patches = jnp.stack(wins, axis=4).reshape(T * B * H, W * KKC)

    # ---------- Pallas K1: conv pre-activations for every step, one matmul ----------
    rows = T * B * H
    n_blocks = 2 if (rows % 2 == 0 and (rows // 2) % 8 == 0) else 1
    row_blk = rows // n_blocks
    z_all = pl.pallas_call(
        _conv_matmul_kernel,
        grid=(n_blocks,),
        in_specs=[pl.BlockSpec((row_blk, W * KKC), lambda i: (i, 0)),
                  pl.BlockSpec((W * KKC, W * Cout), lambda i: (0, 0)),
                  pl.BlockSpec((1, W * Cout), lambda i: (0, 0))],
        out_specs=pl.BlockSpec((row_blk, W * Cout), lambda i: (i, 0)),
        out_shape=jax.ShapeDtypeStruct((rows, W * Cout), jnp.float32),
        compiler_params=pltpu.CompilerParams(dimension_semantics=("parallel",)),
    )(patches, w2, bconv_row)

    # pure row-major reshape: (t,b,h)x(w,c)  ->  one (B, H*W*C) slab per step
    z_steps = z_all.reshape(T, B, HWC)

    # ---------- Pallas K2: fused time recurrence (LIF -> pool -> FC -> LIF) ----------
    kern = functools.partial(_recurrence_kernel, inv_tau=1.0 / tau,
                             hwc=HWC, c_step=Cout, h_step=W * Cout)
    out_acc = pl.pallas_call(
        kern,
        grid=(T,),
        in_specs=[pl.BlockSpec((1, B, HWC), lambda t: (t, 0, 0)),
                  pl.BlockSpec((HWC, FOUT_PAD), lambda t: (0, 0)),
                  pl.BlockSpec((1, FOUT_PAD), lambda t: (0, 0))],
        out_specs=pl.BlockSpec((B, FOUT_PAD), lambda t: (0, 0)),
        out_shape=jax.ShapeDtypeStruct((B, FOUT_PAD), jnp.float32),
        scratch_shapes=[pltpu.VMEM((B, HWC), jnp.float32),                      # v_conv
                        pltpu.VMEM((B, FOUT_PAD), jnp.float32),                 # v_fc
                        pltpu.VMEM((B, HWC + W * Cout + Cout), jnp.float32)],   # spikes (+pool pad)
        compiler_params=pltpu.CompilerParams(dimension_semantics=("arbitrary",)),
    )(z_steps, wfc_big, bfc_row)

    return out_acc[:, :Fout] / float(spike_window)


def init_params(key, *, in_channels, out_channels, ksize, input_size, fc_out):
    """Deterministic synthetic params, PyTorch-default-style uniform ranges."""
    hp = input_size // 2
    fin = out_channels * hp * hp
    k_conv = 1.0 / jnp.sqrt(in_channels * ksize * ksize)
    k_fc = 1.0 / jnp.sqrt(fin)
    k1, k2, k3, k4 = jax.random.split(key, 4)
    return {
        "wconv": jax.random.uniform(k1, (out_channels, in_channels, ksize, ksize),
                                    jnp.float32, -k_conv, k_conv),
        "bconv": jax.random.uniform(k2, (out_channels,), jnp.float32,
                                    -k_conv, k_conv),
        "wfc": jax.random.uniform(k3, (fc_out, fin), jnp.float32, -k_fc, k_fc),
        "bfc": jax.random.uniform(k4, (fc_out,), jnp.float32, -k_fc, k_fc),
    }


if __name__ == "__main__":
    # NetworkBuilder(topology='CONVS_8_3_1_1_FCS_10', input_size=16,
    #                input_channels=4, label_features=10, train_mode='BP',
    #                dropout=0, tau=2.0, spike_window=8)
    B, C_IN, SIZE = 2, 4, 16
    C_OUT, KSIZE, FC_OUT = 8, 3, 10
    SPIKE_WINDOW, TAU = 8, 2.0

    root = jax.random.PRNGKey(0)
    k_params, k_x, k_enc = jax.random.split(root, 3)

    params = init_params(k_params, in_channels=C_IN, out_channels=C_OUT,
                         ksize=KSIZE, input_size=SIZE, fc_out=FC_OUT)
    x = jax.random.uniform(k_x, (B, C_IN, SIZE, SIZE), jnp.float32)  # pixel intensities
    labels = jnp.zeros((B,), jnp.int32)  # unused in 'BP' mode

    fwd = jax.jit(functools.partial(network_forward,
                                    spike_window=SPIKE_WINDOW, tau=TAU))
    out_fr = jax.block_until_ready(fwd(params, x, labels, k_enc))

    assert out_fr.shape == (B, FC_OUT)
    assert bool(jnp.all(jnp.isfinite(out_fr)))
    assert bool(jnp.all((out_fr >= 0.0) & (out_fr <= 1.0)))  # firing rates
    print("KERNEL_OK")
</pallas_src>

<mosaic_0001>
module attributes {stable_mosaic.version = 11 : i64} {
  func.func @_conv_matmul_kernel(%arg0: i32, %arg1: memref<128x576xf32, #tpu.memory_space<vmem>>, %arg2: memref<576x128xf32, #tpu.memory_space<vmem>>, %arg3: memref<1x128xf32, #tpu.memory_space<vmem>>, %arg4: memref<128x128xf32, #tpu.memory_space<vmem>>) attributes {dimension_semantics = [#tpu.dimension_semantics<parallel>], iteration_bounds = array<i64: 2>, scalar_prefetch = 0 : i64, scratch_operands = 0 : i64, tpu.core_type = #tpu.core_type<tc>, window_params = [{transform_indices = @transform_0, window_bounds = array<i64: 128, 576>}, {pipeline_mode = #tpu.pipeline_mode<synchronous>, transform_indices = @transform_1, window_bounds = array<i64: 576, 128>}, {pipeline_mode = #tpu.pipeline_mode<synchronous>, transform_indices = @transform_2, window_bounds = array<i64: 1, 128>}, {transform_indices = @transform_3, window_bounds = array<i64: 128, 128>}]} {
    %c0 = arith.constant 0 : index
    %c0_0 = arith.constant 0 : index
    %0 = vector.load %arg1[%c0, %c0_0] : memref<128x576xf32, #tpu.memory_space<vmem>>, vector<128x576xf32>
    %c0_1 = arith.constant 0 : index
    %c0_2 = arith.constant 0 : index
    %1 = vector.load %arg2[%c0_1, %c0_2] : memref<576x128xf32, #tpu.memory_space<vmem>>, vector<576x128xf32>
    %cst = arith.constant dense<0.000000e+00> : vector<128x128xf32>
    %2 = tpu.matmul %0, %1, %cst {dimension_numbers = #tpu.dot_dimension_numbers<[1], [0], [0], [1], [0, 0, 1, 1], [], []>} : vector<128x576xf32>, vector<576x128xf32>, vector<128x128xf32> -> vector<128x128xf32>
    %c0_3 = arith.constant 0 : index
    %c0_4 = arith.constant 0 : index
    %3 = vector.load %arg3[%c0_3, %c0_4] : memref<1x128xf32, #tpu.memory_space<vmem>>, vector<1x128xf32>
    %4 = vector.broadcast %3 : vector<1x128xf32> to vector<128x128xf32>
    %5 = arith.addf %2, %4 : vector<128x128xf32>
    %c0_5 = arith.constant 0 : index
    %c0_6 = arith.constant 0 : index
    %6 = vector.load %arg4[%c0_5, %c0_6] : memref<128x128xf32, #tpu.memory_space<vmem>>, vector<128x128xf32>
    tpu.vector_store %arg4[%c0_5, %c0_6], %5 {strides = array<i32>} : memref<128x128xf32, #tpu.memory_space<vmem>>, vector<128x128xf32>,
    return
  }
  func.func @transform_0(%arg0: i32) -> (i32, i32) {
    %c0_i32 = arith.constant 0 : i32
    %c0_i32_0 = arith.constant 0 : i32
    return %arg0, %c0_i32 : i32, i32
  }
  func.func @transform_1(%arg0: i32) -> (i32, i32) {
    %c0_i32 = arith.constant 0 : i32
    %c0_i32_0 = arith.constant 0 : i32
    %c0_i32_1 = arith.constant 0 : i32
    return %c0_i32, %c0_i32_0 : i32, i32
  }
  func.func @transform_2(%arg0: i32) -> (i32, i32) {
    %c0_i32 = arith.constant 0 : i32
    %c0_i32_0 = arith.constant 0 : i32
    %c0_i32_1 = arith.constant 0 : i32
    return %c0_i32, %c0_i32_0 : i32, i32
  }
  func.func @transform_3(%arg0: i32) -> (i32, i32) {
    %c0_i32 = arith.constant 0 : i32
    %c0_i32_0 = arith.constant 0 : i32
    return %arg0, %c0_i32 : i32, i32
  }
}

module attributes {stable_mosaic.version = 11 : i64} {
  func.func @_recurrence_kernel(%arg0: i32, %arg1: memref<1x2x2048xf32, #tpu.memory_space<vmem>>, %arg2: memref<2048x128xf32, #tpu.memory_space<vmem>>, %arg3: memref<1x128xf32, #tpu.memory_space<vmem>>, %arg4: memref<2x128xf32, #tpu.memory_space<vmem>>, %arg5: memref<2x2048xf32, #tpu.memory_space<vmem>>, %arg6: memref<2x128xf32, #tpu.memory_space<vmem>>, %arg7: memref<2x2184xf32, #tpu.memory_space<vmem>>) attributes {dimension_semantics = [#tpu.dimension_semantics<arbitrary>], iteration_bounds = array<i64: 8>, scalar_prefetch = 0 : i64, scratch_operands = 3 : i64, tpu.core_type = #tpu.core_type<tc>, window_params = [{transform_indices = @transform_0, window_bounds = array<i64: 1, 2, 2048>}, {pipeline_mode = #tpu.pipeline_mode<synchronous>, transform_indices = @transform_1, window_bounds = array<i64: 2048, 128>}, {pipeline_mode = #tpu.pipeline_mode<synchronous>, transform_indices = @transform_2, window_bounds = array<i64: 1, 128>}, {pipeline_mode = #tpu.pipeline_mode<synchronous>, transform_indices = @transform_3, window_bounds = array<i64: 2, 128>}]} {
    %c0_i32 = arith.constant 0 : i32
    %0 = arith.cmpi eq, %arg0, %c0_i32 : i32
    %1 = arith.extui %0 : i1 to i32
    %c0_i32_0 = arith.constant 0 : i32
    %2 = arith.cmpi ne, %1, %c0_i32_0 : i32
    scf.if %2 {
      %cst_32 = arith.constant 0.000000e+00 : f32
      %45 = vector.broadcast %cst_32 : f32 to vector<2x2048xf32>
      %c0_33 = arith.constant 0 : index
      %c0_34 = arith.constant 0 : index
      %46 = vector.load %arg5[%c0_33, %c0_34] : memref<2x2048xf32, #tpu.memory_space<vmem>>, vector<2x2048xf32>
      tpu.vector_store %arg5[%c0_33, %c0_34], %45 {strides = array<i32>} : memref<2x2048xf32, #tpu.memory_space<vmem>>, vector<2x2048xf32>,
      %cst_35 = arith.constant 0.000000e+00 : f32
      %47 = vector.broadcast %cst_35 : f32 to vector<2x128xf32>
      %c0_36 = arith.constant 0 : index
      %c0_37 = arith.constant 0 : index
      %48 = vector.load %arg6[%c0_36, %c0_37] : memref<2x128xf32, #tpu.memory_space<vmem>>, vector<2x128xf32>
      tpu.vector_store %arg6[%c0_36, %c0_37], %47 {strides = array<i32>} : memref<2x128xf32, #tpu.memory_space<vmem>>, vector<2x128xf32>,
      %cst_38 = arith.constant 0.000000e+00 : f32
      %49 = vector.broadcast %cst_38 : f32 to vector<2x2184xf32>
      %c0_39 = arith.constant 0 : index
      %c0_40 = arith.constant 0 : index
      %50 = vector.load %arg7[%c0_39, %c0_40] : memref<2x2184xf32, #tpu.memory_space<vmem>>, vector<2x2184xf32>
      tpu.vector_store %arg7[%c0_39, %c0_40], %49 {strides = array<i32>} : memref<2x2184xf32, #tpu.memory_space<vmem>>, vector<2x2184xf32>,
      %cst_41 = arith.constant 0.000000e+00 : f32
      %51 = vector.broadcast %cst_41 : f32 to vector<2x128xf32>
      %c0_42 = arith.constant 0 : index
      %c0_43 = arith.constant 0 : index
      %52 = vector.load %arg4[%c0_42, %c0_43] : memref<2x128xf32, #tpu.memory_space<vmem>>, vector<2x128xf32>
      tpu.vector_store %arg4[%c0_42, %c0_43], %51 {strides = array<i32>} : memref<2x128xf32, #tpu.memory_space<vmem>>, vector<2x128xf32>,
    } else {
    }
    %c0 = arith.constant 0 : index
    %c0_1 = arith.constant 0 : index
    %c0_2 = arith.constant 0 : index
    %3 = vector.load %arg1[%c0, %c0_1, %c0_2] : memref<1x2x2048xf32, #tpu.memory_space<vmem>>, vector<1x2x2048xf32>
    %4 = vector.shape_cast %3 : vector<1x2x2048xf32> to vector<2x2048xf32>
    %c0_3 = arith.constant 0 : index
    %c0_4 = arith.constant 0 : index
    %5 = vector.load %arg5[%c0_3, %c0_4] : memref<2x2048xf32, #tpu.memory_space<vmem>>, vector<2x2048xf32>
    %6 = arith.subf %4, %5 : vector<2x2048xf32>
    %cst = arith.constant 5.000000e-01 : f32
    %7 = vector.broadcast %cst : f32 to vector<2x2048xf32>
    %8 = arith.mulf %6, %7 : vector<2x2048xf32>
    %9 = arith.addf %5, %8 : vector<2x2048xf32>
    %cst_5 = arith.constant 1.000000e+00 : f32
    %10 = vector.broadcast %cst_5 : f32 to vector<2x2048xf32>
    %11 = arith.cmpf oge, %9, %10 : vector<2x2048xf32>
    %cst_6 = arith.constant 0.000000e+00 : f32
    %12 = vector.broadcast %cst_6 : f32 to vector<2x2048xf32>
    %13 = arith.select %11, %12, %9 : vector<2x2048xi1>, vector<2x2048xf32>
    %c0_7 = arith.constant 0 : index
    %c0_8 = arith.constant 0 : index
    %14 = vector.load %arg5[%c0_7, %c0_8] : memref<2x2048xf32, #tpu.memory_space<vmem>>, vector<2x2048xf32>
    tpu.vector_store %arg5[%c0_7, %c0_8], %13 {strides = array<i32>} : memref<2x2048xf32, #tpu.memory_space<vmem>>, vector<2x2048xf32>,
    %15 = arith.extui %11 : vector<2x2048xi1> to vector<2x2048xi32>
    %16 = arith.sitofp %15 : vector<2x2048xi32> to vector<2x2048xf32>
    %c0_9 = arith.constant 0 : index
    %c0_10 = arith.constant 0 : index
    %17 = vector.load %arg7[%c0_9, %c0_10] : memref<2x2184xf32, #tpu.memory_space<vmem>>, vector<2x2048xf32>
    tpu.vector_store %arg7[%c0_9, %c0_10], %16 {strides = array<i32>} : memref<2x2184xf32, #tpu.memory_space<vmem>>, vector<2x2048xf32>,
    %c0_11 = arith.constant 0 : index
    %c0_12 = arith.constant 0 : index
    %18 = vector.load %arg7[%c0_11, %c0_12] : memref<2x2184xf32, #tpu.memory_space<vmem>>, vector<2x2048xf32>
    %c0_13 = arith.constant 0 : index
    %c8 = arith.constant 8 : index
    %19 = vector.load %arg7[%c0_13, %c8] : memref<2x2184xf32, #tpu.memory_space<vmem>>, vector<2x2048xf32>
    %20 = arith.maximumf %18, %19 : vector<2x2048xf32>
    %c0_14 = arith.constant 0 : index
    %c128 = arith.constant 128 : index
    %21 = vector.load %arg7[%c0_14, %c128] : memref<2x2184xf32, #tpu.memory_space<vmem>>, vector<2x2048xf32>
    %c0_15 = arith.constant 0 : index
    %c136 = arith.constant 136 : index
    %22 = vector.load %arg7[%c0_15, %c136] : memref<2x2184xf32, #tpu.memory_space<vmem>>, vector<2x2048xf32>
    %23 = arith.maximumf %21, %22 : vector<2x2048xf32>
    %24 = arith.maximumf %20, %23 : vector<2x2048xf32>
    %c0_16 = arith.constant 0 : index
    %c0_17 = arith.constant 0 : index
    %25 = vector.load %arg2[%c0_16, %c0_17] : memref<2048x128xf32, #tpu.memory_space<vmem>>, vector<2048x128xf32>
    %cst_18 = arith.constant dense<0.000000e+00> : vector<2x128xf32>
    %26 = tpu.matmul %24, %25, %cst_18 {dimension_numbers = #tpu.dot_dimension_numbers<[1], [0], [0], [1], [0, 0, 1, 1], [], []>} : vector<2x2048xf32>, vector<2048x128xf32>, vector<2x128xf32> -> vector<2x128xf32>
    %c0_19 = arith.constant 0 : index
    %c0_20 = arith.constant 0 : index
    %27 = vector.load %arg3[%c0_19, %c0_20] : memref<1x128xf32, #tpu.memory_space<vmem>>, vector<1x128xf32>
    %28 = vector.broadcast %27 : vector<1x128xf32> to vector<2x128xf32>
    %29 = arith.addf %26, %28 : vector<2x128xf32>
    %c0_21 = arith.constant 0 : index
    %c0_22 = arith.constant 0 : index
    %30 = vector.load %arg6[%c0_21, %c0_22] : memref<2x128xf32, #tpu.memory_space<vmem>>, vector<2x128xf32>
    %31 = arith.subf %29, %30 : vector<2x128xf32>
    %cst_23 = arith.constant 5.000000e-01 : f32
    %32 = vector.broadcast %cst_23 : f32 to vector<2x128xf32>
    %33 = arith.mulf %31, %32 : vector<2x128xf32>
    %34 = arith.addf %30, %33 : vector<2x128xf32>
    %cst_24 = arith.constant 1.000000e+00 : f32
    %35 = vector.broadcast %cst_24 : f32 to vector<2x128xf32>
    %36 = arith.cmpf oge, %34, %35 : vector<2x128xf32>
    %cst_25 = arith.constant 0.000000e+00 : f32
    %37 = vector.broadcast %cst_25 : f32 to vector<2x128xf32>
    %38 = arith.select %36, %37, %34 : vector<2x128xi1>, vector<2x128xf32>
    %c0_26 = arith.constant 0 : index
    %c0_27 = arith.constant 0 : index
    %39 = vector.load %arg6[%c0_26, %c0_27] : memref<2x128xf32, #tpu.memory_space<vmem>>, vector<2x128xf32>
    tpu.vector_store %arg6[%c0_26, %c0_27], %38 {strides = array<i32>} : memref<2x128xf32, #tpu.memory_space<vmem>>, vector<2x128xf32>,
    %c0_28 = arith.constant 0 : index
    %c0_29 = arith.constant 0 : index
    %40 = vector.load %arg4[%c0_28, %c0_29] : memref<2x128xf32, #tpu.memory_space<vmem>>, vector<2x128xf32>
    %41 = arith.extui %36 : vector<2x128xi1> to vector<2x128xi32>
    %42 = arith.sitofp %41 : vector<2x128xi32> to vector<2x128xf32>
    %43 = arith.addf %40, %42 : vector<2x128xf32>
    %c0_30 = arith.constant 0 : index
    %c0_31 = arith.constant 0 : index
    %44 = vector.load %arg4[%c0_30, %c0_31] : memref<2x128xf32, #tpu.memory_space<vmem>>, vector<2x128xf32>
    tpu.vector_store %arg4[%c0_30, %c0_31], %43 {strides = array<i32>} : memref<2x128xf32, #tpu.memory_space<vmem>>, vector<2x128xf32>,
    return
  }
  func.func @transform_0(%arg0: i32) -> (i32, i32, i32) {
    %c0_i32 = arith.constant 0 : i32
    %c0_i32_0 = arith.constant 0 : i32
    %c0_i32_1 = arith.constant 0 : i32
    return %arg0, %c0_i32, %c0_i32_0 : i32, i32, i32
  }
  func.func @transform_1(%arg0: i32) -> (i32, i32) {
    %c0_i32 = arith.constant 0 : i32
    %c0_i32_0 = arith.constant 0 : i32
    %c0_i32_1 = arith.constant 0 : i32
    return %c0_i32, %c0_i32_0 : i32, i32
  }
  func.func @transform_2(%arg0: i32) -> (i32, i32) {
    %c0_i32 = arith.constant 0 : i32
    %c0_i32_0 = arith.constant 0 : i32
    %c0_i32_1 = arith.constant 0 : i32
    return %c0_i32, %c0_i32_0 : i32, i32
  }
  func.func @transform_3(%arg0: i32) -> (i32, i32) {
    %c0_i32 = arith.constant 0 : i32
    %c0_i32_0 = arith.constant 0 : i32
    %c0_i32_1 = arith.constant 0 : i32
    return %c0_i32, %c0_i32_0 : i32, i32
  }
}

</mosaic_0001>

<bundles_post_ra>
// kernel: tile.8
= control target key start
LH: loop header
LB: loop body
LE: loop exit
PB: predicated region body
PF: predicated region fallthrough
CT: control target
= control target key end

     0   :  { %s28_s0 = inlined_call_operand.vmem [shape: f32[8], index: 0, kind: input, shape index: {}]   ;;  %s29_s1 = inlined_call_operand.vmem [shape: f32[16,8], index: 1, kind: output, shape index: {}]  }
   0x1   :  { %v4_v0 = vld [vmem:[%s28_s0] ss:$0 sm:$0xff] }
   0x2   :  { %5 = vst [vmem:[%s29_s1] sm:$0xff] %v4_v0  ;;  %8 = vst [vmem:[%s29_s1 + $0x8] sm:$0xff] %v4_v0 }

// kernel: tile.9
= control target key start
LH: loop header
LB: loop body
LE: loop exit
PB: predicated region body
PF: predicated region fallthrough
CT: control target
= control target key end

     0   :  { %s131_s10 = smov 120   ;;  %s132_s11 = smov 104   ;;  %vm3_vm0 = vcmask 64512   ;;  %vm9_vm1 = vcmask 1048512   ;;  %vm15_vm2 = vcmask 982912   ;;  %vm21_vm3 = vcmask 917312   ;;  %s207_s0 = inlined_call_operand.vmem [shape: f32[16,8], index: 0, kind: input, shape index: {}]   ;;  %s208_s1 = inlined_call_operand.vmem [shape: f32[1,128], index: 1, kind: output, shape index: {}]  }
   0x1   :  { %v101_v0 = vld [vmem:[%s207_s0 + $0xf] sm:$0x1]   ;;  %v103_v1 = vld [vmem:[%s207_s0 + $0xd] sm:$0x1]   ;;  %v102_v2 = vld [vmem:[%s207_s0 + $0xe] sm:$0x1]  }
   0x2   :  { %7 = vrot.lane.b32.xlu0 %v101_v0, %s131_s10  ;;  %19 = vrot.lane.b32.xlu1 %v103_v1, %s132_s11  ;;  %v104_v3 = vld [vmem:[%s207_s0 + $0xc] sm:$0x1]   ;;  %s133_s16 = smov 112   ;;  %s134_s17 = smov 96   ;;  %v105_v4 = vld [vmem:[%s207_s0 + $0xb] sm:$0x1]  }
   0x3   :  { %v106_v5 = vld [vmem:[%s207_s0 + $0xa] sm:$0x1]   ;;  %v2_v6 = vld [vmem:[%s207_s0] sm:$0x1]   ;;  %s135_s24 = smov 88   ;;  %s136_s25 = smov 80  }
   0x4   :  { %4 = vst.msk [vmem:[#allocation0] sm:$0x1] %vm3_vm0, %v2_v6   ;;  %v107_v7 = vld [vmem:[%s207_s0 + $0x9] sm:$0x1]   ;;  %v108_v8 = vld [vmem:[%s207_s0 + $0x8] sm:$0x1]  }
   0x5   :  { %s137_s30 = smov 72   ;;  %s138_s2 = smov 64   ;;  %v109_v9 = vld [vmem:[%s207_s0 + $0x7] sm:$0x1]   ;;  %v110_v10 = vld [vmem:[%s207_s0 + $0x6] sm:$0x1]  }
   0x6   :  { %13 = vrot.lane.b32.xlu0 %v102_v2, %s133_s16  ;;  %25 = vrot.lane.b32.xlu1 %v104_v3, %s134_s17  ;;  %s139_s7 = smov 56   ;;  %s140_s8 = smov 48   ;;  %v111_v11 = vld [vmem:[%s207_s0 + $0x5] sm:$0x1]   ;;  %v112_v12 = vld [vmem:[%s207_s0 + $0x4] sm:$0x1]  }
   0x7   :  { %s141_s13 = smov 40   ;;  %s142_s14 = smov 32   ;;  %v113_v13 = vld [vmem:[%s207_s0 + $0x3] sm:$0x1]   ;;  %v114_v14 = vld [vmem:[%s207_s0 + $0x2] sm:$0x1]  }
   0x8   :  { %s143_s19 = smov 24   ;;  %s144_s20 = smov 16   ;;  %v115_v15 = vld [vmem:[%s207_s0 + $0x1] sm:$0x1]   ;;  %vm27_vm4 = vcmask 851712   ;;  %vm33_vm5 = vcmask 786112  }
   0x9   :  { %s145_s0 = smov 8   ;;  %vm39_vm6 = vcmask 720512   ;;  %vm45_vm7 = vcmask 654912   ;;  %vm51_vm8 = vcmask 589312   ;;  %vm57_vm9 = vcmask 523712  }
   0xa   :  { %31 = vrot.lane.b32.xlu0 %v105_v4, %s135_s24  ;;  %37 = vrot.lane.b32.xlu1 %v106_v5, %s136_s25  ;;  %vm63_vm10 = vcmask 458112   ;;  %vm69_vm11 = vcmask 392512   ;;  %vm75_vm12 = vcmask 326912   ;;  %vm81_vm13 = vcmask 261312  }
   0xb   :  { %vm87_vm14 = vcmask 195712   ;;  %vm93_vm15 = vcmask 130112  }
   0xe   :  { %43 = vrot.lane.b32.xlu0 %v107_v7, %s137_s30  ;;  %49 = vrot.lane.b32.xlu1 %v108_v8, %s138_s2 }
  0x12   :  { %55 = vrot.lane.b32.xlu0 %v109_v9, %s139_s7  ;;  %61 = vrot.lane.b32.xlu1 %v110_v10, %s140_s8 }
  0x16   :  { %67 = vrot.lane.b32.xlu0 %v111_v11, %s141_s13  ;;  %73 = vrot.lane.b32.xlu1 %v112_v12, %s142_s14 }
  0x1a   :  { %79 = vrot.lane.b32.xlu0 %v113_v13, %s143_s19  ;;  %85 = vrot.lane.b32.xlu1 %v114_v14, %s144_s20 }
  0x1e   :  { %91 = vrot.lane.b32.xlu0 %v115_v15, %s145_s0 }
  0x74   :  { %v8_v16 = vpop.permute.xlu0 %7   ;;  %v20_v17 = vpop.permute.xlu1 %19  }
  0x75   :  { %10 = vst.msk [vmem:[#allocation0] sm:$0x1] %vm9_vm1, %v8_v16  }
  0x78   :  { %v14_v18 = vpop.permute.xlu0 %13   ;;  %v26_v19 = vpop.permute.xlu1 %25  }
  0x79   :  { %16 = vst.msk [vmem:[#allocation0] sm:$0x1] %vm15_vm2, %v14_v18  }
  0x7a   :  { %22 = vst.msk [vmem:[#allocation0] sm:$0x1] %vm21_vm3, %v20_v17  }
  0x7b   :  { %28 = vst.msk [vmem:[#allocation0] sm:$0x1] %vm27_vm4, %v26_v19  }
  0x7c   :  { %v32_v20 = vpop.permute.xlu0 %31   ;;  %v38_v21 = vpop.permute.xlu1 %37  }
  0x7d   :  { %34 = vst.msk [vmem:[#allocation0] sm:$0x1] %vm33_vm5, %v32_v20  }
  0x7e   :  { %40 = vst.msk [vmem:[#allocation0] sm:$0x1] %vm39_vm6, %v38_v21  }
  0x80   :  { %v44_v22 = vpop.permute.xlu0 %43   ;;  %v50_v23 = vpop.permute.xlu1 %49  }
  0x81   :  { %46 = vst.msk [vmem:[#allocation0] sm:$0x1] %vm45_vm7, %v44_v22  }
  0x82   :  { %52 = vst.msk [vmem:[#allocation0] sm:$0x1] %vm51_vm8, %v50_v23  }
  0x84   :  { %v56_v24 = vpop.permute.xlu0 %55   ;;  %v62_v25 = vpop.permute.xlu1 %61  }
  0x85   :  { %58 = vst.msk [vmem:[#allocation0] sm:$0x1] %vm57_vm9, %v56_v24  }
  0x86   :  { %64 = vst.msk [vmem:[#allocation0] sm:$0x1] %vm63_vm10, %v62_v25  }
  0x88   :  { %v68_v26 = vpop.permute.xlu0 %67   ;;  %v74_v27 = vpop.permute.xlu1 %73  }
  0x89   :  { %70 = vst.msk [vmem:[#allocation0] sm:$0x1] %vm69_vm11, %v68_v26  }
  0x8a   :  { %76 = vst.msk [vmem:[#allocation0] sm:$0x1] %vm75_vm12, %v74_v27  }
  0x8c   :  { %v80_v28 = vpop.permute.xlu0 %79   ;;  %v86_v29 = vpop.permute.xlu1 %85  }
  0x8d   :  { %82 = vst.msk [vmem:[#allocation0] sm:$0x1] %vm81_vm13, %v80_v28  }
  0x8e   :  { %88 = vst.msk [vmem:[#allocation0] sm:$0x1] %vm87_vm14, %v86_v29  }
  0x90   :  { %v92_v30 = vpop.permute.xlu0 %91  }
  0x91   :  { %94 = vst.msk [vmem:[#allocation0] sm:$0x1] %vm93_vm15, %v92_v30  }
  0x98   :  { %v98_v31 = vld [vmem:[#allocation0] sm:$0x1] }
  0x99   :  { %100 = vst [vmem:[%s208_s1] sm:$0x1] %v98_v31 }

// kernel: network_forward.2
= control target key start
LH: loop header
LB: loop body
LE: loop exit
PB: predicated region body
PF: predicated region fallthrough
CT: control target
= control target key end

     0   :  { %s1269_s12 = smov 0   ;;  %s1673_s0 = inlined_call_operand.vmem [shape: f32[256,576], index: 0, kind: input, shape index: {}]   ;;  %s1674_s1 = inlined_call_operand.vmem [shape: f32[576,128], index: 1, kind: input, shape index: {}]   ;;  %s1675_s2 = inlined_call_operand.vmem [shape: f32[1,128], index: 2, kind: input, shape index: {}]   ;;  %s1676_s3 = inlined_call_operand.vmem [shape: f32[256,128], index: 3, kind: output, shape index: {}]  }
   0x1 LB: > { %s892_s13 = sadd.s32 4294967295, %s1247_s12   ;;  %p896_p0 = scmp.ge.s32.totalorder %s1247_s12, 1  ;;  %s1247_s12 = sphi %s1269_s12, %s13_s12  }
   0x2   : > { %p139_p1 = scmp.lt.s32.totalorder %s1247_s12, 3 }
   0x4   : > { %p140_p2 = pnand %p896_p0, %p139_p1 }
   0x5   : > { %v273_v0 = vld [vmem:[%s1674_s1 + $0x80] sm:$0xff] (!%p140_p2)  ;;  %v274_v1 = vld [vmem:[%s1674_s1 + $0x88] sm:$0xff] (!%p140_p2)  ;;  %v275_v11 = vld [vmem:[%s1674_s1 + $0x90] sm:$0xff] (!%p140_p2)  ;;  %s1313_s11 = sshll.u32 (!%p140_p2), %s892_s13, 4  ;;  %vm336_vm0 = vcmask (!%p140_p2), 523264  }
   0x6   : > { %143 = sbr.rel (%p140_p2) target bundleno = 334 (0x14e), region = 32  ;;  %v305_v2 = vld [vmem:[%s1674_s1 + $0x180] sm:$0xff] (!%p140_p2)  ;;  %v1144_v3 = vpack.c.bf16 (!%p140_p2), %v274_v1, %v273_v0  ;;  %v306_v4 = vld [vmem:[%s1674_s1 + $0x188] sm:$0xff] (!%p140_p2)  ;;  %v276_v13 = vld [vmem:[%s1674_s1 + $0x98] sm:$0xff] (!%p140_p2)  ;;  %p165_p3 = scmp.lt.s32.totalorder (!%p140_p2), %s1313_s11, 31 }
   0x7   : > { %v257_v5 = vld [vmem:[%s1674_s1] sm:$0xff] (!%p140_p2)  ;;  %v258_v6 = vld [vmem:[%s1674_s1 + $0x8] sm:$0xff] (!%p140_p2)  ;;  %v1176_v7 = vpack.c.bf16 (!%p140_p2), %v306_v4, %v305_v2  ;;  %v307_v14 = vld [vmem:[%s1674_s1 + $0x190] sm:$0xff] (!%p140_p2)  ;;  %v1148_v16 = vpack.c.bf16 (!%p140_p2), %v276_v13, %v275_v11 }
   0x8   : > { %v1146_v8 = vpack.c.bf16 (!%p140_p2), %v258_v6, %v257_v5  ;;  %v289_v9 = vld [vmem:[%s1674_s1 + $0x100] sm:$0xff] (!%p140_p2)  ;;  %v290_v10 = vld [vmem:[%s1674_s1 + $0x108] sm:$0xff] (!%p140_p2)  ;;  %1145 = vmatprep.subr.bf16.mxu0 (!%p140_p2), %v1144_v3  ;;  %v308_v15 = vld [vmem:[%s1674_s1 + $0x198] sm:$0xff] (!%p140_p2) }
   0x9   : > { %v1178_v12 = vpack.c.bf16 (!%p140_p2), %v290_v10, %v289_v9  ;;  %1177 = vmatprep.subr.bf16.mxu1 (!%p140_p2), %v1176_v7  ;;  %v1180_v17 = vpack.c.bf16 (!%p140_p2), %v308_v15, %v307_v14  ;;  %v259_v18 = vld [vmem:[%s1674_s1 + $0x10] sm:$0xff] (!%p140_p2)  ;;  %v260_v19 = vld [vmem:[%s1674_s1 + $0x18] sm:$0xff] (!%p140_p2)  ;;  %v277_v23 = vld [vmem:[%s1674_s1 + $0xa0] sm:$0xff] (!%p140_p2) }
   0xa   : > { %1147 = vmatpush3.bf16.msra.mxu0 (!%p140_p2), %v1146_v8  ;;  %v291_v20 = vld [vmem:[%s1674_s1 + $0x110] sm:$0xff] (!%p140_p2)  ;;  %v1150_v21 = vpack.c.bf16 (!%p140_p2), %v260_v19, %v259_v18  ;;  %v292_v22 = vld [vmem:[%s1674_s1 + $0x118] sm:$0xff] (!%p140_p2)  ;;  %v278_v24 = vld [vmem:[%s1674_s1 + $0xa8] sm:$0xff] (!%p140_p2) }
   0xb   : > { %1179 = vmatpush3.bf16.msra.mxu1 (!%p140_p2), %v1178_v12  ;;  %1149 = vmatprep.subr.bf16.mxu0 (!%p140_p2), %v1148_v16  ;;  %v1182_v25 = vpack.c.bf16 (!%p140_p2), %v292_v22, %v291_v20  ;;  %v1152_v26 = vpack.c.bf16 (!%p140_p2), %v278_v24, %v277_v23  ;;  %v309_v27 = vld [vmem:[%s1674_s1 + $0x1a0] sm:$0xff] (!%p140_p2)  ;;  %v310_v28 = vld [vmem:[%s1674_s1 + $0x1a8] sm:$0xff] (!%p140_p2)  ;;  %v279_v35 = vld [vmem:[%s1674_s1 + $0xb0] sm:$0xff] (!%p140_p2) }
   0xc   : > { %1181 = vmatprep.subr.bf16.mxu1 (!%p140_p2), %v1180_v17  ;;  %v261_v29 = vld [vmem:[%s1674_s1 + $0x20] sm:$0xff] (!%p140_p2)  ;;  %v1184_v30 = vpack.c.bf16 (!%p140_p2), %v310_v28, %v309_v27  ;;  %v262_v31 = vld [vmem:[%s1674_s1 + $0x28] sm:$0xff] (!%p140_p2)  ;;  %v280_v36 = vld [vmem:[%s1674_s1 + $0xb8] sm:$0xff] (!%p140_p2) }
   0xd   : > { %v293_v32 = vld [vmem:[%s1674_s1 + $0x120] sm:$0xff]  ;;  %v294_v33 = vld [vmem:[%s1674_s1 + $0x128] sm:$0xff]  ;;  %v1154_v34 = vpack.c.bf16 %v262_v31, %v261_v29  ;;  %v311_v37 = vld [vmem:[%s1674_s1 + $0x1b0] sm:$0xff]  ;;  %v1156_v39 = vpack.c.bf16 %v280_v36, %v279_v35  ;;  %s1678_s11 = smov (!%p165_p3, %s1313_s11), 31 }
   0xe   : > { %1151 = vmatpush3.bf16.msra.mxu0 %v1150_v21  ;;  %v1186_v38 = vpack.c.bf16 %v294_v33, %v293_v32  ;;  %v312_v40 = vld [vmem:[%s1674_s1 + $0x1b8] sm:$0xff]  ;;  %v263_v41 = vld [vmem:[%s1674_s1 + $0x30] sm:$0xff]  ;;  %v281_v46 = vld [vmem:[%s1674_s1 + $0xc0] sm:$0xff]  ;;  %s1232_s23 = smul.u32 40, %s1678_s11 }
   0xf   : > { %1183 = vmatpush3.bf16.msra.mxu1 %v1182_v25  ;;  %1153 = vmatprep.subr.bf16.mxu0 %v1152_v26  ;;  %v264_v42 = vld [vmem:[%s1674_s1 + $0x38] sm:$0xff]  ;;  %v1188_v43 = vpack.c.bf16 %v312_v40, %v311_v37  ;;  %v295_v44 = vld [vmem:[%s1674_s1 + $0x130] sm:$0xff]  ;;  %v282_v47 = vld [vmem:[%s1674_s1 + $0xc8] sm:$0xff] }
  0x10   : > { %1185 = vmatprep.subr.bf16.mxu1 %v1184_v30  ;;  %v296_v45 = vld [vmem:[%s1674_s1 + $0x138] sm:$0xff]  ;;  %v313_v48 = vld [vmem:[%s1674_s1 + $0x1c0] sm:$0xff]  ;;  %v314_v49 = vld [vmem:[%s1674_s1 + $0x1c8] sm:$0xff]  ;;  %v1158_v50 = vpack.c.bf16 %v264_v42, %v263_v41  ;;  %v1160_v52 = vpack.c.bf16 %v282_v47, %v281_v46  ;;  %s1439_s18 = scalar_lea.vmem %s1673_s0, %s1232_s23 }
  0x11   : > { %v1190_v51 = vpack.c.bf16 %v296_v45, %v295_v44  ;;  %v265_v53 = vld [vmem:[%s1674_s1 + $0x40] sm:$0xff]  ;;  %v266_v54 = vld [vmem:[%s1674_s1 + $0x48] sm:$0xff]  ;;  %v1192_v56 = vpack.c.bf16 %v314_v49, %v313_v48  ;;  %v283_v58 = vld [vmem:[%s1674_s1 + $0xd0] sm:$0xff] }
  0x12   : > { %1155 = vmatpush3.bf16.msra.mxu0 %v1154_v34  ;;  %v297_v55 = vld [vmem:[%s1674_s1 + $0x140] sm:$0xff]  ;;  %v298_v57 = vld [vmem:[%s1674_s1 + $0x148] sm:$0xff]  ;;  %v284_v59 = vld [vmem:[%s1674_s1 + $0xd8] sm:$0xff]  ;;  %v1162_v62 = vpack.c.bf16 %v266_v54, %v265_v53 }
  0x13   : > { %1187 = vmatpush3.bf16.msra.mxu1 %v1186_v38  ;;  %1157 = vmatprep.subr.bf16.mxu0 %v1156_v39  ;;  %v315_v60 = vld [vmem:[%s1674_s1 + $0x1d0] sm:$0xff]  ;;  %v316_v61 = vld [vmem:[%s1674_s1 + $0x1d8] sm:$0xff]  ;;  %v1194_v63 = vpack.c.bf16 %v298_v57, %v297_v55  ;;  %v1164_v0 = vpack.c.bf16 %v284_v59, %v283_v58  ;;  %v285_v6 = vld [vmem:[%s1674_s1 + $0xe0] sm:$0xff] }
  0x14   : > { %1189 = vmatprep.subr.bf16.mxu1 %v1188_v43  ;;  %v267_v1 = vld [vmem:[%s1674_s1 + $0x50] sm:$0xff]  ;;  %v268_v2 = vld [vmem:[%s1674_s1 + $0x58] sm:$0xff]  ;;  %v1196_v4 = vpack.c.bf16 %v316_v61, %v315_v60  ;;  %v286_v7 = vld [vmem:[%s1674_s1 + $0xe8] sm:$0xff] }
  0x15   : > { %v299_v3 = vld [vmem:[%s1674_s1 + $0x150] sm:$0xff]  ;;  %v300_v5 = vld [vmem:[%s1674_s1 + $0x158] sm:$0xff]  ;;  %v317_v8 = vld [vmem:[%s1674_s1 + $0x1e0] sm:$0xff]  ;;  %v1166_v10 = vpack.c.bf16 %v268_v2, %v267_v1  ;;  %v1168_v14 = vpack.c.bf16 %v286_v7, %v285_v6 }
  0x16   : > { %1159 = vmatpush3.bf16.msra.mxu0 %v1158_v50  ;;  %v318_v9 = vld [vmem:[%s1674_s1 + $0x1e8] sm:$0xff]  ;;  %v269_v11 = vld [vmem:[%s1674_s1 + $0x60] sm:$0xff]  ;;  %v1198_v13 = vpack.c.bf16 %v300_v5, %v299_v3  ;;  %v180_v17 = vld [vmem:[%s1439_s18 + $0x18] sm:$0xff] }
  0x17   : > { %1191 = vmatpush3.bf16.msra.mxu1 %v1190_v51  ;;  %1161 = vmatprep.subr.bf16.mxu0 %v1160_v52  ;;  %v270_v12 = vld [vmem:[%s1674_s1 + $0x68] sm:$0xff]  ;;  %v301_v15 = vld [vmem:[%s1674_s1 + $0x160] sm:$0xff]  ;;  %v1200_v18 = vpack.c.bf16 %v318_v9, %v317_v8  ;;  %v287_v20 = vld [vmem:[%s1674_s1 + $0xf0] sm:$0xff] }
  0x18   : > { %1193 = vmatprep.subr.bf16.mxu1 %v1192_v56  ;;  %v178_v16 = vld [vmem:[%s1439_s18 + $0x8] sm:$0xff]  ;;  %v288_v21 = vld [vmem:[%s1674_s1 + $0xf8] sm:$0xff]  ;;  %v319_v22 = vld [vmem:[%s1674_s1 + $0x1f0] sm:$0xff]  ;;  %594 = vmatprep.mubr.f32.mxu1 %v180_v17  ;;  %v1170_v24 = vpack.c.bf16 %v270_v12, %v269_v11 }
  0x19   : > { %v302_v19 = vld [vmem:[%s1674_s1 + $0x168] sm:$0xff]  ;;  %449 = vmatprep.mubr.f32.mxu0 %v178_v16  ;;  %v320_v23 = vld [vmem:[%s1674_s1 + $0x1f8] sm:$0xff]  ;;  %v1172_v26 = vpack.c.bf16 %v288_v21, %v287_v20  ;;  %v271_v27 = vld [vmem:[%s1674_s1 + $0x70] sm:$0xff] }
  0x1a   : > { %1163 = vmatpush3.bf16.msra.mxu0 %v1162_v62  ;;  %v1202_v25 = vpack.c.bf16 %v302_v19, %v301_v15  ;;  %v272_v28 = vld [vmem:[%s1674_s1 + $0x78] sm:$0xff]  ;;  %v303_v29 = vld [vmem:[%s1674_s1 + $0x170] sm:$0xff]  ;;  %v1204_v30 = vpack.c.bf16 %v320_v23, %v319_v22  ;;  %v321_v32 = vld [vmem:[%s1674_s1 + $0x200] sm:$0xff] }
  0x1b   : > { %1195 = vmatpush3.bf16.msra.mxu1 %v1194_v63  ;;  %1165 = vmatprep.subr.bf16.mxu0 %v1164_v0  ;;  %v304_v31 = vld [vmem:[%s1674_s1 + $0x178] sm:$0xff]  ;;  %v322_v33 = vld [vmem:[%s1674_s1 + $0x208] sm:$0xff]  ;;  %v1174_v34 = vpack.c.bf16 %v272_v28, %v271_v27  ;;  %v323_v37 = vld [vmem:[%s1674_s1 + $0x210] sm:$0xff] }
  0x1c   : > { %1197 = vmatprep.subr.bf16.mxu1 %v1196_v4  ;;  %v1206_v35 = vpack.c.bf16 %v304_v31, %v303_v29  ;;  %v1208_v36 = vpack.c.bf16 %v322_v33, %v321_v32  ;;  %v324_v38 = vld [vmem:[%s1674_s1 + $0x218] sm:$0xff]  ;;  %v177_v39 = vld [vmem:[%s1439_s18] sm:$0xff]  ;;  %v179_v40 = vld [vmem:[%s1439_s18 + $0x10] sm:$0xff] }
  0x1d   : > { %v183_v41 = vld [vmem:[%s1439_s18 + $0x30] sm:$0xff]  ;;  %v1212_v42 = vpack.c.bf16 %v324_v38, %v323_v37  ;;  %v185_v43 = vld [vmem:[%s1439_s18 + $0x40] sm:$0xff]  ;;  %v326_v45 = vld [vmem:[%s1674_s1 + $0x228] sm:$0xff] }
  0x1e   : > { %1167 = vmatpush3.bf16.msra.mxu0 %v1166_v10  ;;  %v325_v44 = vld [vmem:[%s1674_s1 + $0x220] sm:$0xff]  ;;  %v182_v46 = vld [vmem:[%s1439_s18 + $0x28] sm:$0xff]  ;;  %v184_v47 = vld [vmem:[%s1439_s18 + $0x38] sm:$0xff] }
  0x1f   : > { %1199 = vmatpush3.bf16.msra.mxu1 %v1198_v13  ;;  %1169 = vmatprep.subr.bf16.mxu0 %v1168_v14  ;;  %v188_v48 = vld [vmem:[%s1439_s18 + $0x58] sm:$0xff]  ;;  %v190_v49 = vld [vmem:[%s1439_s18 + $0x68] sm:$0xff]  ;;  %v1216_v50 = vpack.c.bf16 %v326_v45, %v325_v44  ;;  %v187_v51 = vld [vmem:[%s1439_s18 + $0x50] sm:$0xff] }
  0x20   : > { %1201 = vmatprep.subr.bf16.mxu1 %v1200_v18  ;;  %v327_v52 = vld [vmem:[%s1674_s1 + $0x230] sm:$0xff]  ;;  %v189_v53 = vld [vmem:[%s1439_s18 + $0x60] sm:$0xff]  ;;  %v328_v55 = vld [vmem:[%s1674_s1 + $0x238] sm:$0xff] }
  0x21   : > { %v193_v54 = vld [vmem:[%s1439_s18 + $0x80] sm:$0xff]  ;;  %v195_v56 = vld [vmem:[%s1439_s18 + $0x90] sm:$0xff]  ;;  %v1220_v57 = vpack.c.bf16 %v328_v55, %v327_v52  ;;  %v192_v58 = vld [vmem:[%s1439_s18 + $0x78] sm:$0xff] }
  0x22   : > { %1171 = vmatpush3.bf16.msra.mxu0 %v1170_v24  ;;  %v194_v59 = vld [vmem:[%s1439_s18 + $0x88] sm:$0xff]  ;;  %v200_v61 = vld [vmem:[%s1439_s18 + $0xb8] sm:$0xff]  ;;  %v197_v62 = vld [vmem:[%s1439_s18 + $0xa0] sm:$0xff] }
  0x23   : > { %1203 = vmatpush3.bf16.msra.mxu1 %v1202_v25  ;;  %1173 = vmatprep.subr.bf16.mxu0 %v1172_v26  ;;  %v198_v60 = vld [vmem:[%s1439_s18 + $0xa8] sm:$0xff]  ;;  %v199_v63 = vld [vmem:[%s1439_s18 + $0xb0] sm:$0xff]  ;;  %v205_v1 = vld [vmem:[%s1439_s18 + $0xe0] sm:$0xff] }
  0x24   : > { %1205 = vmatprep.subr.bf16.mxu1 %v1204_v30  ;;  %v203_v0 = vld [vmem:[%s1439_s18 + $0xd0] sm:$0xff]  ;;  %v202_v2 = vld [vmem:[%s1439_s18 + $0xc8] sm:$0xff]  ;;  %v204_v3 = vld [vmem:[%s1439_s18 + $0xd8] sm:$0xff] }
  0x25   : > { %v208_v4 = vld [vmem:[%s1439_s18 + $0xf8] sm:$0xff]  ;;  %v210_v5 = vld [vmem:[%s1439_s18 + $0x108] sm:$0xff]  ;;  %v207_v6 = vld [vmem:[%s1439_s18 + $0xf0] sm:$0xff] }
  0x26   : > { %1175 = vmatpush3.bf16.msra.mxu0 %v1174_v34  ;;  %v209_v7 = vld [vmem:[%s1439_s18 + $0x100] sm:$0xff]  ;;  %v215_v9 = vld [vmem:[%s1439_s18 + $0x130] sm:$0xff]  ;;  %v212_v10 = vld [vmem:[%s1439_s18 + $0x118] sm:$0xff] }
  0x27   : > { %1207 = vmatpush3.bf16.msra.mxu1 %v1206_v35  ;;  %1209 = vmatprep.subr.bf16.mxu0 %v1208_v36  ;;  %v213_v8 = vld [vmem:[%s1439_s18 + $0x120] sm:$0xff]  ;;  %v214_v11 = vld [vmem:[%s1439_s18 + $0x128] sm:$0xff]  ;;  %v220_v13 = vld [vmem:[%s1439_s18 + $0x158] sm:$0xff] }
  0x28   : > { %1224 = vmatprep.subr.bf16.mxu1 %v1208_v36  ;;  %v218_v12 = vld [vmem:[%s1439_s18 + $0x148] sm:$0xff]  ;;  %v217_v14 = vld [vmem:[%s1439_s18 + $0x140] sm:$0xff]  ;;  %v219_v15 = vld [vmem:[%s1439_s18 + $0x150] sm:$0xff] }
  0x29   : > { %450 = vmatmul.mubr.f32.vlgmr.msra.gmra.mrb[0].mxu0 %v177_v39  ;;  %v223_v16 = vld [vmem:[%s1439_s18 + $0x170] sm:$0xff]  ;;  %v225_v17 = vld [vmem:[%s1439_s18 + $0x180] sm:$0xff]  ;;  %v222_v18 = vld [vmem:[%s1439_s18 + $0x168] sm:$0xff] }
  0x2a   : > { %595 = vmatmul.mubr.f32.vlgmr.msra.gmra.mrb[0].mxu1 %v179_v40  ;;  %1211 = vmatpush3.bf16.msra.mxu0 %v1208_v36  ;;  %v224_v19 = vld [vmem:[%s1439_s18 + $0x178] sm:$0xff]  ;;  %v230_v21 = vld [vmem:[%s1439_s18 + $0x1a8] sm:$0xff]  ;;  %v227_v22 = vld [vmem:[%s1439_s18 + $0x190] sm:$0xff] }
  0x2b   : > { %1228 = vmatpush3.bf16.msra.mxu1 %v1208_v36  ;;  %454 = vmatprep.mubr.f32.mxu0 %v183_v41  ;;  %v228_v20 = vld [vmem:[%s1439_s18 + $0x198] sm:$0xff]  ;;  %v229_v23 = vld [vmem:[%s1439_s18 + $0x1a0] sm:$0xff]  ;;  %v235_v25 = vld [vmem:[%s1439_s18 + $0x1d0] sm:$0xff] }
  0x2c   : > { %599 = vmatprep.mubr.f32.mxu1 %v185_v43  ;;  %1213 = vmatprep.subr.bf16.mxu0 %v1212_v42  ;;  %v233_v24 = vld [vmem:[%s1439_s18 + $0x1c0] sm:$0xff]  ;;  %v232_v26 = vld [vmem:[%s1439_s18 + $0x1b8] sm:$0xff]  ;;  %v234_v27 = vld [vmem:[%s1439_s18 + $0x1c8] sm:$0xff] }
  0x2d   : > { %455 = vmatmul.mubr.f32.gmra.mrb[2].mxu0 %v182_v46  ;;  %1225 = vmatprep.subr.bf16.mxu1 %v1212_v42  ;;  %v238_v28 = vld [vmem:[%s1439_s18 + $0x1e8] sm:$0xff]  ;;  %v240_v29 = vld [vmem:[%s1439_s18 + $0x1f8] sm:$0xff]  ;;  %v237_v30 = vld [vmem:[%s1439_s18 + $0x1e0] sm:$0xff] }
  0x2e   : > { %600 = vmatmul.mubr.f32.gmra.mrb[2].mxu1 %v184_v47  ;;  %459 = vmatprep.mubr.f32.mxu0 %v188_v48  ;;  %v239_v31 = vld [vmem:[%s1439_s18 + $0x1f0] sm:$0xff]  ;;  %v245_v33 = vld [vmem:[%s1439_s18 + $0x220] sm:$0xff]  ;;  %v242_v34 = vld [vmem:[%s1439_s18 + $0x208] sm:$0xff] }
  0x2f   : > { %604 = vmatprep.mubr.f32.mxu1 %v190_v49  ;;  %1215 = vmatpush3.bf16.msra.mxu0 %v1212_v42  ;;  %v243_v32 = vld [vmem:[%s1439_s18 + $0x210] sm:$0xff]  ;;  %v244_v35 = vld [vmem:[%s1439_s18 + $0x218] sm:$0xff]  ;;  %v250_v37 = vld [vmem:[%s1439_s18 + $0x248] sm:$0xff] }
  0x30   : > { %1229 = vmatpush3.bf16.msra.mxu1 %v1212_v42  ;;  %1217 = vmatprep.subr.bf16.mxu0 %v1216_v50  ;;  %v248_v36 = vld [vmem:[%s1439_s18 + $0x238] sm:$0xff]  ;;  %v247_v38 = vld [vmem:[%s1439_s18 + $0x230] sm:$0xff]  ;;  %v249_v39 = vld [vmem:[%s1439_s18 + $0x240] sm:$0xff] }
  0x31   : > { %460 = vmatmul.mubr.f32.gmra.mrb[4].mxu0 %v187_v51  ;;  %1226 = vmatprep.subr.bf16.mxu1 %v1216_v50  ;;  %v253_v40 = vld [vmem:[%s1439_s18 + $0x260] sm:$0xff]  ;;  %v255_v41 = vld [vmem:[%s1439_s18 + $0x270] sm:$0xff]  ;;  %v252_v42 = vld [vmem:[%s1439_s18 + $0x258] sm:$0xff] }
  0x32   : > { %605 = vmatmul.mubr.f32.gmra.mrb[4].mxu1 %v189_v53  ;;  %464 = vmatprep.mubr.f32.mxu0 %v193_v54  ;;  %v254_v43 = vld [vmem:[%s1439_s18 + $0x268] sm:$0xff]  ;;  %v181_v44 = vld [vmem:[%s1439_s18 + $0x20] sm:$0xff]  ;;  %v191_v48 = vld [vmem:[%s1439_s18 + $0x70] sm:$0xff] }
  0x33   : > { %609 = vmatprep.mubr.f32.mxu1 %v195_v56  ;;  %1219 = vmatpush3.bf16.msra.mxu0 %v1216_v50  ;;  %v221_v45 = vld [vmem:[%s1439_s18 + $0x160] sm:$0xff]  ;;  %v186_v46 = vld [vmem:[%s1439_s18 + $0x48] sm:$0xff]  ;;  %v231_v49 = vld [vmem:[%s1439_s18 + $0x1b0] sm:$0xff] }
  0x34   : > { %1230 = vmatpush3.bf16.msra.mxu1 %v1216_v50  ;;  %1221 = vmatprep.subr.bf16.mxu0 %v1220_v57  ;;  %v226_v47 = vld [vmem:[%s1439_s18 + $0x188] sm:$0xff]  ;;  %v196_v50 = vld [vmem:[%s1439_s18 + $0x98] sm:$0xff]  ;;  %v201_v52 = vld [vmem:[%s1439_s18 + $0xc0] sm:$0xff] }
  0x35   : > { %465 = vmatmul.mubr.f32.gmra.mrb[6].mxu0 %v192_v58  ;;  %1227 = vmatprep.subr.bf16.mxu1 %v1220_v57  ;;  %v236_v51 = vld [vmem:[%s1439_s18 + $0x1d8] sm:$0xff]  ;;  %v241_v53 = vld [vmem:[%s1439_s18 + $0x200] sm:$0xff]  ;;  %v206_v54 = vld [vmem:[%s1439_s18 + $0xe8] sm:$0xff] }
  0x36   : > { %610 = vmatmul.mubr.f32.gmra.mrb[6].mxu1 %v194_v59  ;;  %469 = vmatprep.mubr.f32.mxu0 %v198_v60  ;;  %v246_v55 = vld [vmem:[%s1439_s18 + $0x228] sm:$0xff]  ;;  %v211_v56 = vld [vmem:[%s1439_s18 + $0x110] sm:$0xff]  ;;  %v216_v58 = vld [vmem:[%s1439_s18 + $0x138] sm:$0xff] }
  0x37   : > { %614 = vmatprep.mubr.f32.mxu1 %v200_v61  ;;  %1223 = vmatpush3.bf16.msra.mxu0 %v1220_v57  ;;  %v256_v59 = vld [vmem:[%s1439_s18 + $0x278] sm:$0xff] }
  0x38   : > { %1231 = vmatpush3.bf16.msra.mxu1 %v1220_v57  ;;  %v251_v57 = vld [vmem:[%s1439_s18 + $0x250] sm:$0xff]  ;;  %s900_s18 = sshll.u32 %s1678_s11, 3 }
  0x39   : > { %470 = vmatmul.mubr.f32.gmra.mrb[8].mxu0 %v197_v62  ;;  %v1606_v62 = vld [vmem:[%s1675_s2] ss:$0 sm:$0xff]  ;;  %s1644_s19 = scalar_lea.vmem %s1676_s3, %s900_s18 }
  0x3a   : > { %615 = vmatmul.mubr.f32.gmra.mrb[8].mxu1 %v199_v63  ;;  %474 = vmatprep.mubr.f32.mxu0 %v203_v0 }
  0x3b   : > { %619 = vmatprep.mubr.f32.mxu1 %v205_v1 }
  0x3d   : > { %475 = vmatmul.mubr.f32.gmra.mrb[10].mxu0 %v202_v2 }
  0x3e   : > { %620 = vmatmul.mubr.f32.gmra.mrb[10].mxu1 %v204_v3  ;;  %479 = vmatprep.mubr.f32.mxu0 %v208_v4 }
  0x3f   : > { %624 = vmatprep.mubr.f32.mxu1 %v210_v5 }
  0x41   : > { %480 = vmatmul.mubr.f32.gmra.mrb[12].mxu0 %v207_v6 }
  0x42   : > { %625 = vmatmul.mubr.f32.gmra.mrb[12].mxu1 %v209_v7  ;;  %484 = vmatprep.mubr.f32.mxu0 %v213_v8 }
  0x43   : > { %629 = vmatprep.mubr.f32.mxu1 %v215_v9 }
  0x45   : > { %485 = vmatmul.mubr.f32.gmra.mrb[14].mxu0 %v212_v10 }
  0x46   : > { %630 = vmatmul.mubr.f32.gmra.mrb[14].mxu1 %v214_v11  ;;  %489 = vmatprep.mubr.f32.mxu0 %v218_v12 }
  0x47   : > { %634 = vmatprep.mubr.f32.mxu1 %v220_v13 }
  0x49   : > { %490 = vmatmul.mubr.f32.gmra.mrb[16].mxu0 %v217_v14 }
  0x4a   : > { %635 = vmatmul.mubr.f32.gmra.mrb[16].mxu1 %v219_v15  ;;  %494 = vmatprep.mubr.f32.mxu0 %v223_v16 }
  0x4b   : > { %639 = vmatprep.mubr.f32.mxu1 %v225_v17 }
  0x4d   : > { %495 = vmatmul.mubr.f32.gmra.mrb[18].mxu0 %v222_v18 }
  0x4e   : > { %640 = vmatmul.mubr.f32.gmra.mrb[18].mxu1 %v224_v19  ;;  %499 = vmatprep.mubr.f32.mxu0 %v228_v20 }
  0x4f   : > { %644 = vmatprep.mubr.f32.mxu1 %v230_v21 }
  0x51   : > { %500 = vmatmul.mubr.f32.gmra.mrb[20].mxu0 %v227_v22 }
  0x52   : > { %645 = vmatmul.mubr.f32.gmra.mrb[20].mxu1 %v229_v23  ;;  %504 = vmatprep.mubr.f32.mxu0 %v233_v24 }
  0x53   : > { %649 = vmatprep.mubr.f32.mxu1 %v235_v25 }
  0x55   : > { %505 = vmatmul.mubr.f32.gmra.mrb[22].mxu0 %v232_v26 }
  0x56   : > { %650 = vmatmul.mubr.f32.gmra.mrb[22].mxu1 %v234_v27  ;;  %509 = vmatprep.mubr.f32.mxu0 %v238_v28 }
  0x57   : > { %654 = vmatprep.mubr.f32.mxu1 %v240_v29 }
  0x59   : > { %510 = vmatmul.mubr.f32.gmra.mrb[24].mxu0 %v237_v30 }
  0x5a   : > { %655 = vmatmul.mubr.f32.gmra.mrb[24].mxu1 %v239_v31  ;;  %514 = vmatprep.mubr.f32.mxu0 %v243_v32 }
  0x5b   : > { %659 = vmatprep.mubr.f32.mxu1 %v245_v33 }
  0x5d   : > { %515 = vmatmul.mubr.f32.gmra.mrb[26].mxu0 %v242_v34 }
  0x5e   : > { %660 = vmatmul.mubr.f32.gmra.mrb[26].mxu1 %v244_v35  ;;  %519 = vmatprep.mubr.f32.mxu0 %v248_v36 }
  0x5f   : > { %664 = vmatprep.mubr.f32.mxu1 %v250_v37 }
  0x61   : > { %520 = vmatmul.mubr.f32.gmra.mrb[28].mxu0 %v247_v38 }
  0x62   : > { %665 = vmatmul.mubr.f32.gmra.mrb[28].mxu1 %v249_v39  ;;  %524 = vmatprep.mubr.f32.mxu0 %v253_v40 }
  0x63   : > { %669 = vmatprep.mubr.f32.mxu1 %v255_v41 }
  0x65   : > { %525 = vmatmul.mubr.f32.gmra.mrb[30].mxu0 %v252_v42 }
  0x66   : > { %670 = vmatmul.mubr.f32.gmra.mrb[30].mxu1 %v254_v43  ;;  %1120 = vmatprep.mubr.msk.f32.mxu0 %vm336_vm0, %v181_v44 }
  0x67   : > { %1132 = vmatprep.mubr.msk.f32.mxu1 %vm336_vm0, %v221_v45 }
  0x69   : > { %1121 = vmatmul.mubr.msk.f32.vlgmr.msra.gmra.mrb[32].mxu0 %vm336_vm0, %v186_v46 }
  0x6a   : > { %1133 = vmatmul.mubr.msk.f32.vlgmr.msra.gmra.mrb[32].mxu1 %vm336_vm0, %v226_v47  ;;  %1123 = vmatprep.mubr.msk.f32.mxu0 %vm336_vm0, %v191_v48 }
  0x6b   : > { %1135 = vmatprep.mubr.msk.f32.mxu1 %vm336_vm0, %v231_v49 }
  0x6d   : > { %1124 = vmatmul.mubr.msk.f32.gmra.mrb[34].mxu0 %vm336_vm0, %v196_v50 }
  0x6e   : > { %1136 = vmatmul.mubr.msk.f32.gmra.mrb[34].mxu1 %vm336_vm0, %v236_v51  ;;  %1126 = vmatprep.mubr.msk.f32.mxu0 %vm336_vm0, %v201_v52 }
  0x6f   : > { %1138 = vmatprep.mubr.msk.f32.mxu1 %vm336_vm0, %v241_v53 }
  0x71   : > { %1127 = vmatmul.mubr.msk.f32.gmra.mrb[36].mxu0 %vm336_vm0, %v206_v54 }
  0x72   : > { %1139 = vmatmul.mubr.msk.f32.gmra.mrb[36].mxu1 %vm336_vm0, %v246_v55  ;;  %1129 = vmatprep.mubr.msk.f32.mxu0 %vm336_vm0, %v211_v56 }
  0x73   : > { %1141 = vmatprep.mubr.msk.f32.mxu1 %vm336_vm0, %v251_v57 }
  0x75   : > { %1130 = vmatmul.mubr.msk.f32.gmra.mrb[38].mxu0 %vm336_vm0, %v216_v58 }
  0x76   : > { %1142 = vmatmul.mubr.msk.f32.gmra.mrb[38].mxu1 %vm336_vm0, %v256_v59 }
  0xfc   : > { %v952_v60 = vpop.f32.mrb[0].mxu0 }
  0xfd   : > { %v1032_v61 = vpop.f32.mrb[0].mxu1  ;;  %v953_v63 = vpop.f32.mrb[1].mxu0 }
  0xfe   : > { %v954_v0 = vadd.f32 %v953_v63, %v952_v60  ;;  %v1033_v1 = vpop.f32.mrb[1].mxu1 }
  0xff   : > { %v1034_v2 = vadd.f32 %v1033_v1, %v1032_v61 }
 0x100   : > { %v452_v3 = vadd.f32 %v954_v0, %v1606_v62  ;;  %v955_v4 = vpop.f32.mrb[2].mxu0 }
 0x101   : > { %v1035_v5 = vpop.f32.mrb[2].mxu1  ;;  %v956_v6 = vpop.f32.mrb[3].mxu0 }
 0x102   : > { %v957_v7 = vadd.f32 %v956_v6, %v955_v4  ;;  %v1036_v8 = vpop.f32.mrb[3].mxu1  ;;  %v1609_v9 = vadd.f32 %v1034_v2, %v452_v3 }
 0x103   : > { %v1037_v10 = vadd.f32 %v1036_v8, %v1035_v5 }
 0x104   : > { %v457_v11 = vadd.f32 %v957_v7, %v1606_v62  ;;  %v958_v12 = vpop.f32.mrb[4].mxu0 }
 0x105   : > { %v1038_v13 = vpop.f32.mrb[4].mxu1  ;;  %v959_v14 = vpop.f32.mrb[5].mxu0 }
 0x106   : > { %v960_v15 = vadd.f32 %v959_v14, %v958_v12  ;;  %v1039_v16 = vpop.f32.mrb[5].mxu1  ;;  %v1612_v17 = vadd.f32 %v1037_v10, %v457_v11 }
 0x107   : > { %v1040_v18 = vadd.f32 %v1039_v16, %v1038_v13 }
 0x108   : > { %v462_v19 = vadd.f32 %v960_v15, %v1606_v62  ;;  %v961_v20 = vpop.f32.mrb[6].mxu0 }
 0x109   : > { %v1041_v21 = vpop.f32.mrb[6].mxu1  ;;  %v962_v22 = vpop.f32.mrb[7].mxu0 }
 0x10a   : > { %v963_v23 = vadd.f32 %v962_v22, %v961_v20  ;;  %v1042_v24 = vpop.f32.mrb[7].mxu1  ;;  %v1615_v25 = vadd.f32 %v1040_v18, %v462_v19 }
 0x10b   : > { %v1043_v26 = vadd.f32 %v1042_v24, %v1041_v21 }
 0x10c   : > { %v467_v27 = vadd.f32 %v963_v23, %v1606_v62  ;;  %v964_v28 = vpop.f32.mrb[8].mxu0 }
 0x10d   : > { %v1044_v29 = vpop.f32.mrb[8].mxu1  ;;  %v965_v30 = vpop.f32.mrb[9].mxu0 }
 0x10e   : > { %v966_v31 = vadd.f32 %v965_v30, %v964_v28  ;;  %v1045_v32 = vpop.f32.mrb[9].mxu1  ;;  %v1618_v33 = vadd.f32 %v1043_v26, %v467_v27 }
 0x10f   : > { %v1046_v34 = vadd.f32 %v1045_v32, %v1044_v29 }
 0x110   : > { %v472_v35 = vadd.f32 %v966_v31, %v1606_v62  ;;  %v967_v36 = vpop.f32.mrb[10].mxu0 }
 0x111   : > { %v1047_v37 = vpop.f32.mrb[10].mxu1  ;;  %v968_v38 = vpop.f32.mrb[11].mxu0 }
 0x112   : > { %v969_v39 = vadd.f32 %v968_v38, %v967_v36  ;;  %v1048_v40 = vpop.f32.mrb[11].mxu1  ;;  %v1621_v41 = vadd.f32 %v1046_v34, %v472_v35 }
 0x113   : > { %v1049_v42 = vadd.f32 %v1048_v40, %v1047_v37 }
 0x114   : > { %v477_v43 = vadd.f32 %v969_v39, %v1606_v62  ;;  %v970_v44 = vpop.f32.mrb[12].mxu0 }
 0x115   : > { %v1050_v45 = vpop.f32.mrb[12].mxu1  ;;  %v971_v46 = vpop.f32.mrb[13].mxu0 }
 0x116   : > { %v972_v47 = vadd.f32 %v971_v46, %v970_v44  ;;  %v1051_v48 = vpop.f32.mrb[13].mxu1  ;;  %v1624_v49 = vadd.f32 %v1049_v42, %v477_v43 }
 0x117   : > { %v1052_v50 = vadd.f32 %v1051_v48, %v1050_v45 }
 0x118   : > { %v482_v51 = vadd.f32 %v972_v47, %v1606_v62  ;;  %v973_v52 = vpop.f32.mrb[14].mxu0 }
 0x119   : > { %v1053_v53 = vpop.f32.mrb[14].mxu1  ;;  %v974_v54 = vpop.f32.mrb[15].mxu0 }
 0x11a   : > { %v975_v55 = vadd.f32 %v974_v54, %v973_v52  ;;  %v1054_v56 = vpop.f32.mrb[15].mxu1  ;;  %v1627_v57 = vadd.f32 %v1052_v50, %v482_v51 }
 0x11b   : > { %v1055_v58 = vadd.f32 %v1054_v56, %v1053_v53 }
 0x11c   : > { %v487_v59 = vadd.f32 %v975_v55, %v1606_v62  ;;  %v976_v60 = vpop.f32.mrb[16].mxu0 }
 0x11d   : > { %v1056_v61 = vpop.f32.mrb[16].mxu1  ;;  %v977_v63 = vpop.f32.mrb[17].mxu0 }
 0x11e   : > { %v978_v0 = vadd.f32 %v977_v63, %v976_v60  ;;  %v1057_v1 = vpop.f32.mrb[17].mxu1  ;;  %v1630_v2 = vadd.f32 %v1055_v58, %v487_v59 }
 0x11f   : > { %v1058_v3 = vadd.f32 %v1057_v1, %v1056_v61 }
 0x120   : > { %v492_v4 = vadd.f32 %v978_v0, %v1606_v62  ;;  %v979_v5 = vpop.f32.mrb[18].mxu0 }
 0x121   : > { %v1059_v6 = vpop.f32.mrb[18].mxu1  ;;  %v980_v7 = vpop.f32.mrb[19].mxu0 }
 0x122   : > { %v981_v8 = vadd.f32 %v980_v7, %v979_v5  ;;  %v1060_v10 = vpop.f32.mrb[19].mxu1  ;;  %v637_v11 = vadd.f32 %v1058_v3, %v492_v4 }
 0x123   : > { %v1061_v12 = vadd.f32 %v1060_v10, %v1059_v6 }
 0x124   : > { %v497_v13 = vadd.f32 %v981_v8, %v1606_v62  ;;  %v982_v14 = vpop.f32.mrb[20].mxu0 }
 0x125   : > { %v1062_v15 = vpop.f32.mrb[20].mxu1  ;;  %v983_v16 = vpop.f32.mrb[21].mxu0 }
 0x126   : > { %v984_v18 = vadd.f32 %v983_v16, %v982_v14  ;;  %v1063_v19 = vpop.f32.mrb[21].mxu1  ;;  %v642_v20 = vadd.f32 %v1061_v12, %v497_v13 }
 0x127   : > { %v1064_v21 = vadd.f32 %v1063_v19, %v1062_v15 }
 0x128   : > { %v502_v22 = vadd.f32 %v984_v18, %v1606_v62  ;;  %v985_v23 = vpop.f32.mrb[22].mxu0 }
 0x129   : > { %v1065_v24 = vpop.f32.mrb[22].mxu1  ;;  %v986_v26 = vpop.f32.mrb[23].mxu0 }
 0x12a   : > { %v987_v27 = vadd.f32 %v986_v26, %v985_v23  ;;  %v1066_v28 = vpop.f32.mrb[23].mxu1  ;;  %v647_v29 = vadd.f32 %v1064_v21, %v502_v22 }
 0x12b   : > { %v1067_v30 = vadd.f32 %v1066_v28, %v1065_v24 }
 0x12c   : > { %v507_v31 = vadd.f32 %v987_v27, %v1606_v62  ;;  %v988_v32 = vpop.f32.mrb[24].mxu0 }
 0x12d   : > { %v1068_v34 = vpop.f32.mrb[24].mxu1  ;;  %v989_v35 = vpop.f32.mrb[25].mxu0 }
 0x12e   : > { %v990_v36 = vadd.f32 %v989_v35, %v988_v32  ;;  %v1069_v37 = vpop.f32.mrb[25].mxu1  ;;  %v652_v38 = vadd.f32 %v1067_v30, %v507_v31 }
 0x12f   : > { %v1070_v39 = vadd.f32 %v1069_v37, %v1068_v34 }
 0x130   : > { %v512_v40 = vadd.f32 %v990_v36, %v1606_v62  ;;  %v991_v42 = vpop.f32.mrb[26].mxu0 }
 0x131   : > { %v1071_v43 = vpop.f32.mrb[26].mxu1  ;;  %v992_v44 = vpop.f32.mrb[27].mxu0 }
 0x132   : > { %v993_v45 = vadd.f32 %v992_v44, %v991_v42  ;;  %v1072_v46 = vpop.f32.mrb[27].mxu1  ;;  %v657_v47 = vadd.f32 %v1070_v39, %v512_v40 }
 0x133   : > { %v1073_v48 = vadd.f32 %v1072_v46, %v1071_v43 }
 0x134   : > { %v517_v50 = vadd.f32 %v993_v45, %v1606_v62  ;;  %v994_v51 = vpop.f32.mrb[28].mxu0 }
 0x135   : > { %v1074_v52 = vpop.f32.mrb[28].mxu1  ;;  %v995_v53 = vpop.f32.mrb[29].mxu0 }
 0x136   : > { %v996_v54 = vadd.f32 %v995_v53, %v994_v51  ;;  %v1075_v55 = vpop.f32.mrb[29].mxu1  ;;  %v662_v56 = vadd.f32 %v1073_v48, %v517_v50 }
 0x137   : > { %v1076_v58 = vadd.f32 %v1075_v55, %v1074_v52 }
 0x138   : > { %v522_v59 = vadd.f32 %v996_v54, %v1606_v62  ;;  %v997_v60 = vpop.f32.mrb[30].mxu0 }
 0x139   : > { %v1077_v61 = vpop.f32.mrb[30].mxu1  ;;  %v998_v63 = vpop.f32.mrb[31].mxu0 }
 0x13a   : > { %v999_v0 = vadd.f32 %v998_v63, %v997_v60  ;;  %v1078_v1 = vpop.f32.mrb[31].mxu1  ;;  %v667_v3 = vadd.f32 %v1076_v58, %v522_v59 }
 0x13b   : > { %v1079_v4 = vadd.f32 %v1078_v1, %v1077_v61 }
 0x13c   : > { %v527_v5 = vadd.f32 %v999_v0, %v1606_v62  ;;  %v1122_v6 = vpop.f32.mrb[32].mxu0 }
 0x13d   : > { %v747_v7 = vadd.f32 %v1122_v6, %v1612_v17  ;;  %v1134_v8 = vpop.f32.mrb[32].mxu1  ;;  %v741_v10 = vpop.f32.mrb[33].mxu0 }
 0x13e   : > { %v787_v12 = vadd.f32 %v1134_v8, %v642_v20  ;;  %v742_v13 = vadd.f32 %v741_v10, %v1609_v9  ;;  %v781_v14 = vpop.f32.mrb[33].mxu1  ;;  %v672_v62 = vadd.f32 %v1079_v4, %v527_v5 }
 0x13f   : > { %821 = vst [vmem:[%s1644_s19 + $0x8] sm:$0xff] %v747_v7  ;;  %v782_v15 = vadd.f32 %v781_v14, %v637_v11 }
 0x140   : > { %829 = vst [vmem:[%s1644_s19 + $0x48] sm:$0xff] %v787_v12  ;;  %820 = vst [vmem:[%s1644_s19] sm:$0xff] %v742_v13  ;;  %v1125_v16 = vpop.f32.mrb[34].mxu0 }
 0x141   : > { %828 = vst [vmem:[%s1644_s19 + $0x40] sm:$0xff] %v782_v15  ;;  %v757_v18 = vadd.f32 %v1125_v16, %v1618_v33  ;;  %v1137_v17 = vpop.f32.mrb[34].mxu1  ;;  %v751_v19 = vpop.f32.mrb[35].mxu0 }
 0x142   : > { %v797_v20 = vadd.f32 %v1137_v17, %v652_v38  ;;  %v752_v21 = vadd.f32 %v751_v19, %v1615_v25  ;;  %v791_v9 = vpop.f32.mrb[35].mxu1 }
 0x143   : > { %823 = vst [vmem:[%s1644_s19 + $0x18] sm:$0xff] %v757_v18  ;;  %v792_v22 = vadd.f32 %v791_v9, %v647_v29 }
 0x144   : > { %831 = vst [vmem:[%s1644_s19 + $0x58] sm:$0xff] %v797_v20  ;;  %822 = vst [vmem:[%s1644_s19 + $0x10] sm:$0xff] %v752_v21  ;;  %v1128_v11 = vpop.f32.mrb[36].mxu0 }
 0x145   : > { %830 = vst [vmem:[%s1644_s19 + $0x50] sm:$0xff] %v792_v22  ;;  %v767_v23 = vadd.f32 %v1128_v11, %v1624_v49  ;;  %v1140_v24 = vpop.f32.mrb[36].mxu1  ;;  %v761_v33 = vpop.f32.mrb[37].mxu0 }
 0x146   : > { %v807_v26 = vadd.f32 %v1140_v24, %v662_v56  ;;  %v762_v27 = vadd.f32 %v761_v33, %v1621_v41  ;;  %v801_v25 = vpop.f32.mrb[37].mxu1 }
 0x147   : > { %825 = vst [vmem:[%s1644_s19 + $0x28] sm:$0xff] %v767_v23  ;;  %v802_v28 = vadd.f32 %v801_v25, %v657_v47 }
 0x148   : > { %833 = vst [vmem:[%s1644_s19 + $0x68] sm:$0xff] %v807_v26  ;;  %824 = vst [vmem:[%s1644_s19 + $0x20] sm:$0xff] %v762_v27  ;;  %v1131_v29 = vpop.f32.mrb[38].mxu0 }
 0x149   : > { %832 = vst [vmem:[%s1644_s19 + $0x60] sm:$0xff] %v802_v28  ;;  %v777_v30 = vadd.f32 %v1131_v29, %v1630_v2  ;;  %v1143_v31 = vpop.f32.mrb[38].mxu1  ;;  %v771_v49 = vpop.f32.mrb[39].mxu0 }
 0x14a   : > { %v817_v32 = vadd.f32 %v1143_v31, %v672_v62  ;;  %v772_v34 = vadd.f32 %v771_v49, %v1627_v57  ;;  %v811_v35 = vpop.f32.mrb[39].mxu1 }
 0x14b   : > { %827 = vst [vmem:[%s1644_s19 + $0x38] sm:$0xff] %v777_v30  ;;  %v812_v41 = vadd.f32 %v811_v35, %v667_v3 }
 0x14c   : > { %835 = vst [vmem:[%s1644_s19 + $0x78] sm:$0xff] %v817_v32  ;;  %826 = vst [vmem:[%s1644_s19 + $0x30] sm:$0xff] %v772_v34 }
 0x14d   : > { %834 = vst [vmem:[%s1644_s19 + $0x70] sm:$0xff] %v812_v41 }
 0x14e PF: > { %s13_s12 = sadd.s32 1, %s1247_s12  }
 0x14f   : > { %p10_p4 = scmp.ge.s32.totalorder %s13_s12, 4  }
 0x151   :  { %12 = sbr.rel (!%p10_p4) target bundleno = 1 (0x1), region = 62 }

// kernel: network_forward.3
= control target key start
LH: loop header
LB: loop body
LE: loop exit
PB: predicated region body
PF: predicated region fallthrough
CT: control target
= control target key end

     0   :  { %s1868_s12 = smov 0   ;;  %s2802_s0 = inlined_call_operand.vmem [shape: f32[8,2,2048], index: 0, kind: input, shape index: {}]   ;;  %s2803_s1 = inlined_call_operand.vmem [shape: f32[2048,128], index: 1, kind: input, shape index: {}]   ;;  %s2804_s2 = inlined_call_operand.vmem [shape: f32[1,128], index: 2, kind: input, shape index: {}]   ;;  %s2805_s3 = inlined_call_operand.vmem [shape: f32[2,128], index: 3, kind: output, shape index: {}]  }
   0x1 LB: > { %s1257_s13 = sadd.s32 4294967295, %s1842_s12   ;;  %p1260_p0 = scmp.ge.s32.totalorder %s1842_s12, 1  ;;  %s1842_s12 = sphi %s1868_s12, %s13_s12  }
   0x2   : > { %p132_p1 = scmp.lt.s32.totalorder %s1842_s12, 9 }
   0x4   : > { %p133_p2 = pnand %p1260_p0, %p132_p1 }
   0x5   : > { %p151_p3 = scmp.lt.s32.totalorder (!%p133_p2), %s1257_s13, 7  ;;  %p1263_p4 = scmp.ne.s32.totalorder (!%p133_p2), %s1257_s13, 0 }
   0x6   : > { %136 = sbr.rel (%p133_p2) target bundleno = 501 (0x1f5), region = 32 }
   0xd   : > { %s152_s14 = scalar_select %p151_p3, %s1257_s13, 7 }
   0xe   : > { %159 = sbr.rel (%p1263_p4) target bundleno = 22 (0x16), region = 36  ;;  %vm169_vm0 = vcmask (!%p1263_p4), 1041408   ;;  %vm170_vm1 = vcmask (!%p1263_p4), 60418   ;;  %v1844_v0 = vmov (!%p1263_p4), 0.0  }
   0xf   : > { %s1272_s15 = sshll.u32 %s152_s14, 5  ;;  %160 = vst [vmem:[#allocation2] sm:$0xff] (!%p1263_p4), %v1844_v0  ;;  %161 = vst [vmem:[#allocation2 + $0x8] sm:$0xff] (!%p1263_p4), %v1844_v0 }
  0x10   : > { %s155_s18 = scalar_lea.vmem %s2802_s0, %s1272_s15  ;;  %162 = vst [vmem:[#allocation2 + $0x10] sm:$0xff] (!%p1263_p4), %v1844_v0  ;;  %163 = vst [vmem:[#allocation2 + $0x18] sm:$0xff] (!%p1263_p4), %v1844_v0 }
  0x11   : > { %164 = vst [vmem:[#allocation3] sm:$0x3] (!%p1263_p4), %v1844_v0  ;;  %165 = vst [vmem:[#allocation4] sm:$0xff] (!%p1263_p4), %v1844_v0 }
  0x12   : > { %166 = vst [vmem:[#allocation4 + $0x8] sm:$0xff] (!%p1263_p4), %v1844_v0  ;;  %167 = vst [vmem:[#allocation4 + $0x10] sm:$0xff] (!%p1263_p4), %v1844_v0 }
  0x13   : > { %168 = vst [vmem:[#allocation4 + $0x18] sm:$0xff] (!%p1263_p4), %v1844_v0  ;;  %173 = vst [vmem:[%s2805_s3] sm:$0x3] (!%p1263_p4), %v1844_v0 }
  0x14   : > { %vm171_vm2 = vmor (!%p1263_p4), %vm170_vm1, %vm169_vm0 }
  0x15   : > { %172 = vst.msk [vmem:[#allocation4 + $0x20] sm:$0xf] %vm171_vm2, %v1844_v0 }
  0x16 PF: > { %v176_v1 = vld [vmem:[%s155_s18 + $0x10] sm:$0xff]  ;;  %v177_v2 = vld [vmem:[%s155_s18 + $0x18] sm:$0xff]  ;;  %v174_v6 = vld [vmem:[%s155_s18] sm:$0xff]  ;;  %v1845_v40 = vmov 0.0   ;;  %s1846_s23 = smov 120   ;;  %vm243_vm7 = vcmask 1045504  }
  0x17   : > { %v175_v7 = vld [vmem:[%s155_s18 + $0x8] sm:$0xff]  ;;  %v178_v9 = vld [vmem:[#allocation2] sm:$0xff]  ;;  %v324_v31 = vld [vmem:[%s2803_s1 + $0x90] sm:$0xff]  ;;  %vm245_vm8 = vcmask 982016  }
  0x18   : > { %v180_v3 = vld [vmem:[#allocation2 + $0x10] sm:$0xff]  ;;  %v181_v4 = vld [vmem:[#allocation2 + $0x18] sm:$0xff]  ;;  %v179_v10 = vld [vmem:[#allocation2 + $0x8] sm:$0xff]  ;;  %v182_v12 = vsub.f32 %v174_v6, %v178_v9 }
  0x19   : > { %v184_v5 = vsub.f32 %v176_v1, %v180_v3  ;;  %v185_v8 = vsub.f32 %v177_v2, %v181_v4  ;;  %v183_v13 = vsub.f32 %v175_v7, %v179_v10  ;;  %v322_v14 = vld [vmem:[%s2803_s1 + $0x80] sm:$0xff]  ;;  %v323_v15 = vld [vmem:[%s2803_s1 + $0x88] sm:$0xff]  ;;  %v325_v32 = vld [vmem:[%s2803_s1 + $0x98] sm:$0xff] }
  0x1a   : > { %v1553_v17 = vpack.c.bf16 %v323_v15, %v322_v14  ;;  %v306_v18 = vld [vmem:[%s2803_s1] sm:$0xff]  ;;  %v307_v19 = vld [vmem:[%s2803_s1 + $0x8] sm:$0xff]  ;;  %v186_v22 = vmul.f32 0.5, %v182_v12  ;;  %v308_v33 = vld [vmem:[%s2803_s1 + $0x10] sm:$0xff]  ;;  %v1557_v36 = vpack.c.bf16 %v325_v32, %v324_v31 }
  0x1b   : > { %v188_v11 = vmul.f32 0.5, %v184_v5  ;;  %v189_v16 = vmul.f32 0.5, %v185_v8  ;;  %v354_v20 = vld [vmem:[%s2803_s1 + $0x180] sm:$0xff]  ;;  %v187_v23 = vmul.f32 0.5, %v183_v13  ;;  %v1555_v24 = vpack.c.bf16 %v307_v19, %v306_v18  ;;  %v355_v25 = vld [vmem:[%s2803_s1 + $0x188] sm:$0xff]  ;;  %v309_v37 = vld [vmem:[%s2803_s1 + $0x18] sm:$0xff] }
  0x1c   : > { %v338_v26 = vld [vmem:[%s2803_s1 + $0x100] sm:$0xff]  ;;  %v339_v27 = vld [vmem:[%s2803_s1 + $0x108] sm:$0xff]  ;;  %1554 = vmatprep.subr.bf16.mxu0 %v1553_v17  ;;  %v1585_v29 = vpack.c.bf16 %v355_v25, %v354_v20  ;;  %v190_v34 = vadd.f32 %v186_v22, %v178_v9  ;;  %v356_v38 = vld [vmem:[%s2803_s1 + $0x190] sm:$0xff]  ;;  %v1559_v43 = vpack.c.bf16 %v309_v37, %v308_v33 }
  0x1d   : > { %v192_v21 = vadd.f32 %v188_v11, %v180_v3  ;;  %v193_v28 = vadd.f32 %v189_v16, %v181_v4  ;;  %v1587_v30 = vpack.c.bf16 %v339_v27, %v338_v26  ;;  %v191_v35 = vadd.f32 %v187_v23, %v179_v10  ;;  %1556 = vmatpush3.bf16.msra.mxu0 %v1555_v24  ;;  %v357_v39 = vld [vmem:[%s2803_s1 + $0x198] sm:$0xff]  ;;  %v340_v44 = vld [vmem:[%s2803_s1 + $0x110] sm:$0xff]  ;;  %v326_v46 = vld [vmem:[%s2803_s1 + $0xa0] sm:$0xff] }
  0x1e   : > { %1586 = vmatprep.subr.bf16.mxu1 %v1585_v29  ;;  %v341_v45 = vld [vmem:[%s2803_s1 + $0x118] sm:$0xff]  ;;  %vm194_vm5 = vcmp.ge.f32.partialorder %v190_v34, 1.0  ;;  %1558 = vmatprep.subr.bf16.mxu0 %v1557_v36  ;;  %v327_v49 = vld [vmem:[%s2803_s1 + $0xa8] sm:$0xff]  ;;  %v310_v50 = vld [vmem:[%s2803_s1 + $0x20] sm:$0xff]  ;;  %v1589_v58 = vpack.c.bf16 %v357_v39, %v356_v38 }
  0x1f   : > { %vm196_vm3 = vcmp.ge.f32.partialorder %v192_v21, 1.0  ;;  %vm197_vm4 = vcmp.ge.f32.partialorder %v193_v28, 1.0  ;;  %vm195_vm6 = vcmp.ge.f32.partialorder %v191_v35, 1.0  ;;  %1588 = vmatpush3.bf16.msra.mxu1 %v1587_v30  ;;  %v1948_v52 = vsel %vm194_vm5, 1.0, %v1845_v40  ;;  %v311_v55 = vld [vmem:[%s2803_s1 + $0x28] sm:$0xff]  ;;  %v358_v56 = vld [vmem:[%s2803_s1 + $0x1a0] sm:$0xff] }
  0x20   : > { %v1925_v41 = vsel %vm196_vm3, 1.0, %v1845_v40  ;;  %v200_v42 = vsel %vm196_vm3, 0.0, %v192_v21  ;;  %v201_v47 = vsel %vm197_vm4, 0.0, %v193_v28  ;;  %v1937_v48 = vsel %vm197_vm4, 1.0, %v1845_v40  ;;  %214 = vst [vmem:[#allocation4] sm:$0xff] %v1948_v52  ;;  %v359_v61 = vld [vmem:[%s2803_s1 + $0x1a8] sm:$0xff]  ;;  %1590 = vmatprep.subr.bf16.mxu1 %v1589_v58 }
  0x21   : > { %216 = vst [vmem:[#allocation4 + $0x10] sm:$0xff] %v1925_v41  ;;  %204 = vst [vmem:[#allocation2 + $0x10] sm:$0xff] %v200_v42  ;;  %v199_v51 = vsel %vm195_vm6, 0.0, %v191_v35  ;;  %v1951_v53 = vsel %vm195_vm6, 1.0, %v1845_v40  ;;  %v198_v54 = vsel %vm194_vm5, 0.0, %v190_v34  ;;  %1560 = vmatpush3.bf16.msra.mxu0 %v1559_v43  ;;  %v1591_v59 = vpack.c.bf16 %v341_v45, %v340_v44  ;;  %v342_v62 = vld [vmem:[%s2803_s1 + $0x120] sm:$0xff] }
  0x22   : > { %205 = vst [vmem:[#allocation2 + $0x18] sm:$0xff] %v201_v47  ;;  %217 = vst [vmem:[#allocation4 + $0x18] sm:$0xff] %v1937_v48  ;;  %v1821_v57 = vpack.i.bf16 %v1951_v53, %v1948_v52  ;;  %v1561_v60 = vpack.c.bf16 %v327_v49, %v326_v46  ;;  %v343_v63 = vld [vmem:[%s2803_s1 + $0x128] sm:$0xff]  ;;  %v1563_v0 = vpack.c.bf16 %v311_v55, %v310_v50  ;;  %v328_v2 = vld [vmem:[%s2803_s1 + $0xb0] sm:$0xff] }
  0x23   : > { %203 = vst [vmem:[#allocation2 + $0x8] sm:$0xff] %v199_v51  ;;  %215 = vst [vmem:[#allocation4 + $0x8] sm:$0xff] %v1951_v53  ;;  %v1593_v1 = vpack.c.bf16 %v359_v61, %v358_v56  ;;  %v329_v3 = vld [vmem:[%s2803_s1 + $0xb8] sm:$0xff]  ;;  %v312_v4 = vld [vmem:[%s2803_s1 + $0x30] sm:$0xff]  ;;  %1592 = vmatpush3.bf16.msra.mxu1 %v1591_v59  ;;  %v1595_v9 = vpack.c.bf16 %v343_v63, %v342_v62 }
  0x24   : > { %202 = vst [vmem:[#allocation2] sm:$0xff] %v198_v54  ;;  %1822 = vrot.lane.b32.xlu0 %v1821_v57, %s1846_s23  ;;  %v1565_v5 = vpack.c.bf16 %v329_v3, %v328_v2  ;;  %v313_v6 = vld [vmem:[%s2803_s1 + $0x38] sm:$0xff]  ;;  %v360_v7 = vld [vmem:[%s2803_s1 + $0x1b0] sm:$0xff]  ;;  %1562 = vmatprep.subr.bf16.mxu0 %v1561_v60  ;;  %v330_v11 = vld [vmem:[%s2803_s1 + $0xc0] sm:$0xff] }
  0x25   : > { %v361_v8 = vld [vmem:[%s2803_s1 + $0x1b8] sm:$0xff]  ;;  %v344_v10 = vld [vmem:[%s2803_s1 + $0x130] sm:$0xff]  ;;  %1564 = vmatpush3.bf16.msra.mxu0 %v1563_v0  ;;  %1594 = vmatprep.subr.bf16.mxu1 %v1593_v1  ;;  %v1567_v12 = vpack.c.bf16 %v313_v6, %v312_v4  ;;  %v331_v15 = vld [vmem:[%s2803_s1 + $0xc8] sm:$0xff] }
  0x26   : > { %v1597_v13 = vpack.c.bf16 %v361_v8, %v360_v7  ;;  %v345_v14 = vld [vmem:[%s2803_s1 + $0x138] sm:$0xff]  ;;  %v314_v16 = vld [vmem:[%s2803_s1 + $0x40] sm:$0xff]  ;;  %1566 = vmatprep.subr.bf16.mxu0 %v1565_v5  ;;  %v1569_v17 = vpack.c.bf16 %v331_v15, %v330_v11  ;;  %v315_v18 = vld [vmem:[%s2803_s1 + $0x48] sm:$0xff] }
  0x27   : > { %v362_v19 = vld [vmem:[%s2803_s1 + $0x1c0] sm:$0xff]  ;;  %v363_v20 = vld [vmem:[%s2803_s1 + $0x1c8] sm:$0xff]  ;;  %1596 = vmatpush3.bf16.msra.mxu1 %v1595_v9  ;;  %v1599_v26 = vpack.c.bf16 %v345_v14, %v344_v10  ;;  %v332_v27 = vld [vmem:[%s2803_s1 + $0xd0] sm:$0xff]  ;;  %v1571_v29 = vpack.c.bf16 %v315_v18, %v314_v16 }
  0x28   : > { %v346_v22 = vld [vmem:[%s2803_s1 + $0x140] sm:$0xff]  ;;  %1598 = vmatprep.subr.bf16.mxu1 %v1597_v13  ;;  %v1601_v30 = vpack.c.bf16 %v363_v20, %v362_v19  ;;  %v347_v31 = vld [vmem:[%s2803_s1 + $0x148] sm:$0xff]  ;;  %v333_v32 = vld [vmem:[%s2803_s1 + $0xd8] sm:$0xff] }
  0x29   : > { %v2015_v21 = vld [vmem:[#allocation4 + $0x12] sm:$0xff]  ;;  %1568 = vmatpush3.bf16.msra.mxu0 %v1567_v12  ;;  %v1573_v34 = vpack.c.bf16 %v333_v32, %v332_v27  ;;  %v334_v38 = vld [vmem:[%s2803_s1 + $0xe0] sm:$0xff]  ;;  %v335_v39 = vld [vmem:[%s2803_s1 + $0xe8] sm:$0xff]  ;;  %v1603_v43 = vpack.c.bf16 %v347_v31, %v346_v22  ;;  %v1847_v27 = vmov 1983009808  }
  0x2a   : > { %v1831_v23 = vpack.i.bf16 %v2015_v21, %v1925_v41  ;;  %v2022_v24 = vld [vmem:[#allocation4 + $0x2] sm:$0xff]  ;;  %v2024_v25 = vld [vmem:[#allocation4 + $0xa] sm:$0xff]  ;;  %1570 = vmatprep.subr.bf16.mxu0 %v1569_v17  ;;  %v317_v35 = vld [vmem:[%s2803_s1 + $0x58] sm:$0xff]  ;;  %v1577_v50 = vpack.c.bf16 %v335_v39, %v334_v38 }
  0x2b   : > { %v1826_v28 = vpack.i.bf16 %v2024_v25, %v2022_v24  ;;  %v316_v33 = vld [vmem:[%s2803_s1 + $0x50] sm:$0xff]  ;;  %v365_v37 = vld [vmem:[%s2803_s1 + $0x1d8] sm:$0xff]  ;;  %1600 = vmatpush3.bf16.msra.mxu1 %v1599_v26  ;;  %v318_v49 = vld [vmem:[%s2803_s1 + $0x60] sm:$0xff] }
  0x2c   : > { %1832 = vrot.lane.b32.xlu1 %v1831_v23, %s1846_s23  ;;  %v364_v36 = vld [vmem:[%s2803_s1 + $0x1d0] sm:$0xff]  ;;  %v2057_v42 = vld [vmem:[#allocation4 + $0x1a] sm:$0xff]  ;;  %1602 = vmatprep.subr.bf16.mxu1 %v1601_v30  ;;  %v1575_v44 = vpack.c.bf16 %v317_v35, %v316_v33  ;;  %v319_v51 = vld [vmem:[%s2803_s1 + $0x68] sm:$0xff] }
  0x2d   : > { %1827 = vrot.lane.b32.xlu0 %v1826_v28, %s1846_s23  ;;  %1572 = vmatpush3.bf16.msra.mxu0 %v1571_v29  ;;  %v1605_v45 = vpack.c.bf16 %v365_v37, %v364_v36  ;;  %v348_v46 = vld [vmem:[%s2803_s1 + $0x150] sm:$0xff]  ;;  %v349_v47 = vld [vmem:[%s2803_s1 + $0x158] sm:$0xff]  ;;  %v366_v54 = vld [vmem:[%s2803_s1 + $0x1e0] sm:$0xff]  ;;  %v1579_v61 = vpack.c.bf16 %v319_v51, %v318_v49  ;;  %v575_v28 = vunpack.c.l.s4 %v1847_v27  ;;  %v577_v29 = vlaneseq }
  0x2e   : > { %1574 = vmatprep.subr.bf16.mxu0 %v1573_v34  ;;  %v367_v55 = vld [vmem:[%s2803_s1 + $0x1e8] sm:$0xff]  ;;  %v222_v56 = vld [vmem:[#allocation4 + $0x20] sm:$0x3]  ;;  %v336_v57 = vld [vmem:[%s2803_s1 + $0xf0] sm:$0xff]  ;;  %v1607_v60 = vpack.c.bf16 %v349_v47, %v348_v46 }
  0x2f   : > { %v337_v58 = vld [vmem:[%s2803_s1 + $0xf8] sm:$0xff]  ;;  %v265_v59 = vld [vmem:[#allocation4 + $0x22] sm:$0x3]  ;;  %1604 = vmatpush3.bf16.msra.mxu1 %v1603_v43  ;;  %v1609_v62 = vpack.c.bf16 %v367_v55, %v366_v54  ;;  %v351_v0 = vld [vmem:[%s2803_s1 + $0x168] sm:$0xff]  ;;  %v576_v43 = vunpack.c.0.s8 %v575_v28 }
  0x30   : > { %234 = vrot.lane.b32.xlu1 %v1937_v48, %s1846_s23  ;;  %1606 = vmatprep.subr.bf16.mxu1 %v1605_v45  ;;  %v350_v63 = vld [vmem:[%s2803_s1 + $0x160] sm:$0xff]  ;;  %v320_v1 = vld [vmem:[%s2803_s1 + $0x70] sm:$0xff]  ;;  %v1581_v2 = vpack.c.bf16 %v337_v58, %v336_v57  ;;  %v321_v3 = vld [vmem:[%s2803_s1 + $0x78] sm:$0xff] }
  0x31   : > { %277 = vrot.lane.b32.xlu0 %v2057_v42, %s1846_s23  ;;  %1576 = vmatpush3.bf16.msra.mxu0 %v1575_v44  ;;  %v368_v4 = vld [vmem:[%s2803_s1 + $0x1f0] sm:$0xff]  ;;  %v369_v5 = vld [vmem:[%s2803_s1 + $0x1f8] sm:$0xff]  ;;  %v386_v6 = vld [vmem:[%s2803_s1 + $0x280] sm:$0xff]  ;;  %v1611_v8 = vpack.c.bf16 %v351_v0, %v350_v63  ;;  %v1583_v9 = vpack.c.bf16 %v321_v3, %v320_v1  ;;  %v578_v44 = vshrl.u32 %v577_v29, 7 }
  0x32   : > { %1578 = vmatprep.subr.bf16.mxu0 %v1577_v50  ;;  %v387_v7 = vld [vmem:[%s2803_s1 + $0x288] sm:$0xff]  ;;  %v1613_v10 = vpack.c.bf16 %v369_v5, %v368_v4  ;;  %v352_v11 = vld [vmem:[%s2803_s1 + $0x170] sm:$0xff]  ;;  %v353_v12 = vld [vmem:[%s2803_s1 + $0x178] sm:$0xff] }
  0x33   : > { %1608 = vmatpush3.bf16.msra.mxu1 %v1607_v60  ;;  %v1617_v13 = vpack.c.bf16 %v387_v7, %v386_v6  ;;  %v418_v14 = vld [vmem:[%s2803_s1 + $0x380] sm:$0xff]  ;;  %v419_v15 = vld [vmem:[%s2803_s1 + $0x388] sm:$0xff]  ;;  %v1615_v16 = vpack.c.bf16 %v353_v12, %v352_v11  ;;  %v388_v11 = vld [vmem:[%s2803_s1 + $0x290] sm:$0xff] }
  0x34   : > { %236 = vrot.lane.b32.xlu1 %v222_v56, %s1846_s23  ;;  %1610 = vmatprep.subr.bf16.mxu1 %v1609_v62  ;;  %v1649_v17 = vpack.c.bf16 %v419_v15, %v418_v14  ;;  %v370_v4 = vld [vmem:[%s2803_s1 + $0x200] sm:$0xff]  ;;  %v389_v12 = vld [vmem:[%s2803_s1 + $0x298] sm:$0xff] }
  0x35   : > { %279 = vrot.lane.b32.xlu0 %v265_v59, %s1846_s23  ;;  %1580 = vmatpush3.bf16.msra.mxu0 %v1579_v61  ;;  %v2155_v61 = vsub.s32 %v576_v43, %v578_v44  ;;  %v402_v7 = vld [vmem:[%s2803_s1 + $0x300] sm:$0xff]  ;;  %v404_v43 = vld [vmem:[%s2803_s1 + $0x310] sm:$0xff]  ;;  %v405_v44 = vld [vmem:[%s2803_s1 + $0x318] sm:$0xff] }
  0x36   : > { %1582 = vmatprep.subr.bf16.mxu0 %v1581_v2 }
  0x37   : > { %1612 = vmatpush3.bf16.msra.mxu1 %v1611_v8 }
  0x38   : > { %1614 = vmatprep.subr.bf16.mxu1 %v1613_v10  ;;  %v403_v10 = vld [vmem:[%s2803_s1 + $0x308] sm:$0xff] }
  0x39   : > { %1584 = vmatpush3.bf16.msra.mxu0 %v1583_v9 }
  0x3a   : > { %1618 = vmatprep.subr.bf16.mxu0 %v1617_v13 }
  0x3b   : > { %1616 = vmatpush3.bf16.msra.mxu1 %v1615_v16 }
  0x3c   : > { %1650 = vmatprep.subr.bf16.mxu1 %v1649_v17 }
  0x96   : > { %v1823_v18 = vpop.permute.xlu0 %1822 }
  0x97   : > { %v1825_v19 = vunpack.i.h.bf16 %v1823_v18  ;;  %v1824_v20 = vunpack.i.l.bf16 %v1823_v18  ;;  %v420_v18 = vld [vmem:[%s2803_s1 + $0x390] sm:$0xff] }
  0x99   : > { %v239_v22 = vrot.slane %v1825_v19, 2  ;;  %v238_v23 = vrot.slane %v1824_v20, 2 }
  0x9b   : > { %v244_v33 = vsel %vm243_vm7, %v238_v23, %v239_v22  ;;  %v373_v23 = vld [vmem:[%s2803_s1 + $0x218] sm:$0xff] }
  0x9c   : > { %v246_v47 = vsel %vm245_vm8, %v1824_v20, %v244_v33  ;;  %v1621_v33 = vpack.c.bf16 %v389_v12, %v388_v11  ;;  %v408_v12 = vld [vmem:[%s2803_s1 + $0x330] sm:$0xff] }
  0x9d   : > { %v257_v59 = vmax.f32 %v1948_v52, %v246_v47  ;;  %v371_v52 = vld [vmem:[%s2803_s1 + $0x208] sm:$0xff] }
  0x9e   : > { %v2125_v26 = vpop.permute.xlu1 %1832  ;;  %v1619_v16 = vpack.c.bf16 %v371_v52, %v370_v4  ;;  %v423_v47 = vld [vmem:[%s2803_s1 + $0x3a8] sm:$0xff]  ;;  %v425_v4 = vld [vmem:[%s2803_s1 + $0x3b8] sm:$0xff] }
  0x9f   : > { %v1835_v30 = vunpack.i.h.bf16 %v2125_v26  ;;  %v1834_v31 = vunpack.i.l.bf16 %v2125_v26  ;;  %v1828_v32 = vpop.permute.xlu0 %1827  ;;  %v399_v26 = vld [vmem:[%s2803_s1 + $0x2e8] sm:$0xff] }
  0xa0   : > { %v1830_v34 = vunpack.i.h.bf16 %v1828_v32  ;;  %v1829_v35 = vunpack.i.l.bf16 %v1828_v32  ;;  %v1651_v32 = vpack.c.bf16 %v403_v10, %v402_v7  ;;  %v395_v10 = vld [vmem:[%s2803_s1 + $0x2c8] sm:$0xff] }
  0xa1   : > { %v2132_v36 = vrot.slane %v1835_v30, 2  ;;  %v2136_v37 = vrot.slane %v1834_v31, 2 }
  0xa2   : > { %v282_v38 = vrot.slane %v1830_v34, 2  ;;  %v281_v39 = vrot.slane %v1829_v35, 2  ;;  %v2138_v45 = vpop.permute.xlu1 %234 }
  0xa3   : > { %v247_v46 = vsel %vm243_vm7, %v239_v22, %v2136_v37  ;;  %v2143_v49 = vpop.permute.xlu0 %277  ;;  %v241_v63 = vrot.slane %v2138_v45, 2  ;;  %v372_v22 = vld [vmem:[%s2803_s1 + $0x210] sm:$0xff] }
  0xa4   : > { %v248_v50 = vsel %vm245_vm8, %v1825_v19, %v247_v46  ;;  %v288_v51 = vsel %vm243_vm7, %v282_v38, %v2132_v36  ;;  %v286_v54 = vsel %vm243_vm7, %v281_v39, %v282_v38  ;;  %v421_v19 = vld [vmem:[%s2803_s1 + $0x398] sm:$0xff]  ;;  %v1623_v46 = vpack.c.bf16 %v373_v23, %v372_v22 }
  0xa5   : > { %v258_v55 = vmax.f32 %v1951_v53, %v248_v50  ;;  %v289_v56 = vsel %vm245_vm8, %v1830_v34, %v288_v51  ;;  %v287_v57 = vsel %vm245_vm8, %v1829_v35, %v286_v54  ;;  %v390_v34 = vld [vmem:[%s2803_s1 + $0x2a0] sm:$0xff]  ;;  %v391_v35 = vld [vmem:[%s2803_s1 + $0x2a8] sm:$0xff]  ;;  %v1653_v39 = vpack.c.bf16 %v421_v19, %v420_v18 }
  0xa6   : > { %v299_v58 = vmax.f32 %v2024_v25, %v289_v56  ;;  %v298_v60 = vmax.f32 %v2022_v24, %v287_v57  ;;  %v237_v62 = vpop.permute.xlu1 %236  ;;  %v284_v24 = vrot.slane %v2143_v49, 2  ;;  %v1625_v54 = vpack.c.bf16 %v391_v35, %v390_v34  ;;  %v375_v56 = vld [vmem:[%s2803_s1 + $0x228] sm:$0xff]  ;;  %v378_v18 = vld [vmem:[%s2803_s1 + $0x240] sm:$0xff]  ;;  %v380_v35 = vld [vmem:[%s2803_s1 + $0x250] sm:$0xff] }
  0xa7   : > { %v242_v0 = vrot.slane %v237_v62, 2  ;;  %v280_v1 = vpop.permute.xlu0 %279  ;;  %v1655_v57 = vpack.c.bf16 %v405_v44, %v404_v43  ;;  %v379_v19 = vld [vmem:[%s2803_s1 + $0x248] sm:$0xff]  ;;  %v249_v23 = vsel %vm243_vm7, %v2136_v37, %v241_v63  ;;  %v413_v43 = vld [vmem:[%s2803_s1 + $0x358] sm:$0xff] }
  0xa8   : > { %v302_v2 = vmax.f32 %v257_v59, %v298_v60  ;;  %v303_v3 = vmax.f32 %v258_v55, %v299_v58  ;;  %v285_v53 = vrot.slane %v280_v1, 2  ;;  %v374_v55 = vld [vmem:[%s2803_s1 + $0x220] sm:$0xff]  ;;  %v392_v58 = vld [vmem:[%s2803_s1 + $0x2b0] sm:$0xff]  ;;  %v393_v59 = vld [vmem:[%s2803_s1 + $0x2b8] sm:$0xff] }
  0xa9   : > { %v251_v25 = vsel %vm243_vm7, %v241_v63, %v242_v0  ;;  %v406_v1 = vld [vmem:[%s2803_s1 + $0x320] sm:$0xff]  ;;  %v411_v37 = vld [vmem:[%s2803_s1 + $0x348] sm:$0xff]  ;;  %v429_v63 = vld [vmem:[%s2803_s1 + $0x3d8] sm:$0xff] }
  0xaa   : > { %v580_v5 = vrot.slane %v302_v2, %v2155_v61  ;;  %v573_v6 = vcombine.high %v302_v2, %v302_v2  ;;  %v590_v8 = vcombine.high %v303_v3, %v303_v3  ;;  %v2173_v9 = vrot.slane %v303_v3, %v2155_v61  ;;  %v407_v2 = vld [vmem:[%s2803_s1 + $0x328] sm:$0xff] }
  0xab   : > { %v252_v13 = vsel %vm245_vm8, %v2138_v45, %v251_v25  ;;  %v292_v14 = vsel %vm243_vm7, %v284_v24, %v285_v53  ;;  %v1627_v3 = vpack.c.bf16 %v375_v56, %v374_v55  ;;  %v424_v53 = vld [vmem:[%s2803_s1 + $0x3b0] sm:$0xff]  ;;  %v1629_v25 = vpack.c.bf16 %v393_v59, %v392_v58  ;;  %v410_v45 = vld [vmem:[%s2803_s1 + $0x340] sm:$0xff]  ;;  %v401_v56 = vld [vmem:[%s2803_s1 + $0x2f8] sm:$0xff] }
  0xac   : > { %v588_v15 = vcombine.high %v580_v5, %v580_v5  ;;  %v587_v17 = vrot.slane %v573_v6, %v2155_v61  ;;  %v2197_v20 = vrot.slane %v590_v8, %v2155_v61  ;;  %v260_v27 = vmax.f32 %v1937_v48, %v252_v13  ;;  %v377_v6 = vld [vmem:[%s2803_s1 + $0x238] sm:$0xff]  ;;  %v394_v8 = vld [vmem:[%s2803_s1 + $0x2c0] sm:$0xff]  ;;  %v400_v55 = vld [vmem:[%s2803_s1 + $0x2f0] sm:$0xff] }
  0xad   : > { %v293_v28 = vsel %vm245_vm8, %v2143_v49, %v292_v14  ;;  %v605_v48 = vcombine.high %v2173_v9, %v2173_v9  ;;  %v1659_v7 = vpack.c.bf16 %v407_v2, %v406_v1  ;;  %v1661_v11 = vpack.c.bf16 %v425_v4, %v424_v53  ;;  %v409_v13 = vld [vmem:[%s2803_s1 + $0x338] sm:$0xff]  ;;  %v428_v49 = vld [vmem:[%s2803_s1 + $0x3d0] sm:$0xff]  ;;  %v414_v58 = vld [vmem:[%s2803_s1 + $0x360] sm:$0xff] }
  0xae   : > { %721 = vmatprep.mubr.f32.mxu0 %v588_v15  ;;  %v589_v29 = vcombine.high %v587_v17, %v587_v17  ;;  %v301_v38 = vmax.f32 %v2057_v42, %v293_v28  ;;  %v422_v42 = vld [vmem:[%s2803_s1 + $0x3a0] sm:$0xff]  ;;  %v606_v51 = vcombine.high %v2197_v20, %v2197_v20  ;;  %v1663_v22 = vpack.c.bf16 %v409_v13, %v408_v12  ;;  %v396_v28 = vld [vmem:[%s2803_s1 + $0x2d0] sm:$0xff]  ;;  %v415_v59 = vld [vmem:[%s2803_s1 + $0x368] sm:$0xff] }
  0xaf   : > { %722 = vmatmul.mubr.f32.vlgmr.msra.gmra.mrb[0].mxu0 %v580_v5  ;;  %v1657_v0 = vpack.c.bf16 %v423_v47, %v422_v42  ;;  %v376_v5 = vld [vmem:[%s2803_s1 + $0x230] sm:$0xff]  ;;  %v426_v15 = vld [vmem:[%s2803_s1 + $0x3c0] sm:$0xff]  ;;  %v433_v1 = vld [vmem:[%s2803_s1 + $0x3f8] sm:$0xff] }
  0xb0   : > { %1620 = vmatpush3.bf16.msra.mxu0 %v1619_v16  ;;  %791 = vmatprep.mubr.f32.mxu1 %v589_v29  ;;  %v305_v50 = vmax.f32 %v260_v27, %v301_v38  ;;  %v1631_v14 = vpack.c.bf16 %v377_v6, %v376_v5  ;;  %v427_v16 = vld [vmem:[%s2803_s1 + $0x3c8] sm:$0xff]  ;;  %v290_v27 = vsel %vm243_vm7, %v2132_v36, %v284_v24  ;;  %v397_v29 = vld [vmem:[%s2803_s1 + $0x2d8] sm:$0xff]  ;;  %v430_v47 = vld [vmem:[%s2803_s1 + $0x3e0] sm:$0xff] }
  0xb1   : > { %861 = vmatprep.mubr.f32.mxu0 %v605_v48  ;;  %792 = vmatmul.mubr.f32.vlgmr.msra.gmra.mrb[0].mxu1 %v587_v17  ;;  %v1633_v17 = vpack.c.bf16 %v395_v10, %v394_v8  ;;  %v1635_v36 = vpack.c.bf16 %v379_v19, %v378_v18  ;;  %v250_v24 = vsel %vm245_vm8, %v1834_v31, %v249_v23  ;;  %v381_v38 = vld [vmem:[%s2803_s1 + $0x258] sm:$0xff]  ;;  %v398_v31 = vld [vmem:[%s2803_s1 + $0x2e0] sm:$0xff]  ;;  %v384_v53 = vld [vmem:[%s2803_s1 + $0x270] sm:$0xff] }
  0xb2   : > { %1652 = vmatpush3.bf16.msra.mxu1 %v1651_v32  ;;  %1622 = vmatprep.subr.bf16.mxu0 %v1621_v33  ;;  %v2244_v60 = vrot.slane %v305_v50, %v2155_v61  ;;  %v624_v62 = vcombine.high %v305_v50, %v305_v50  ;;  %v1665_v32 = vpack.c.bf16 %v427_v16, %v426_v15  ;;  %v431_v50 = vld [vmem:[%s2803_s1 + $0x3e8] sm:$0xff]  ;;  %v385_v4 = vld [vmem:[%s2803_s1 + $0x278] sm:$0xff]  ;;  %v450_v5 = vld [vmem:[%s2803_s1 + $0x480] sm:$0xff] }
  0xb3   : > { %931 = vmatprep.mubr.f32.mxu1 %v606_v51  ;;  %1654 = vmatprep.subr.bf16.mxu1 %v1653_v39  ;;  %v291_v33 = vsel %vm245_vm8, %v1835_v30, %v290_v27  ;;  %v1637_v34 = vpack.c.bf16 %v397_v29, %v396_v28  ;;  %v1667_v48 = vpack.c.bf16 %v411_v37, %v410_v45  ;;  %v412_v39 = vld [vmem:[%s2803_s1 + $0x350] sm:$0xff]  ;;  %v451_v6 = vld [vmem:[%s2803_s1 + $0x488] sm:$0xff]  ;;  %v417_v10 = vld [vmem:[%s2803_s1 + $0x378] sm:$0xff] }
  0xb4   : > { %1624 = vmatpush3.bf16.msra.mxu0 %v1623_v46  ;;  %v2259_v52 = vrot.slane %v624_v62, %v2155_v61  ;;  %v1669_v30 = vpack.c.bf16 %v429_v63, %v428_v49  ;;  %v259_v44 = vmax.f32 %v1925_v41, %v250_v24  ;;  %v300_v46 = vmax.f32 %v2015_v21, %v291_v33  ;;  %v383_v41 = vld [vmem:[%s2803_s1 + $0x268] sm:$0xff]  ;;  %v416_v8 = vld [vmem:[%s2803_s1 + $0x370] sm:$0xff]  ;;  %v482_v12 = vld [vmem:[%s2803_s1 + $0x580] sm:$0xff] }
  0xb5   : > { %1626 = vmatprep.subr.bf16.mxu0 %v1625_v54  ;;  %v1639_v42 = vpack.c.bf16 %v381_v38, %v380_v35  ;;  %v1641_v51 = vpack.c.bf16 %v399_v26, %v398_v31  ;;  %v382_v54 = vld [vmem:[%s2803_s1 + $0x260] sm:$0xff]  ;;  %v1671_v21 = vpack.c.bf16 %v413_v43, %v412_v39  ;;  %v483_v13 = vld [vmem:[%s2803_s1 + $0x588] sm:$0xff]  ;;  %v1681_v15 = vpack.c.bf16 %v451_v6, %v450_v5  ;;  %v453_v23 = vld [vmem:[%s2803_s1 + $0x498] sm:$0xff] }
  0xb6   : > { %1656 = vmatpush3.bf16.msra.mxu1 %v1655_v57  ;;  %v1673_v57 = vpack.c.bf16 %v431_v50, %v430_v47  ;;  %v1643_v62 = vpack.c.bf16 %v383_v41, %v382_v54  ;;  %v304_v2 = vmax.f32 %v259_v44, %v300_v46  ;;  %v434_v16 = vld [vmem:[%s2803_s1 + $0x400] sm:$0xff]  ;;  %v1679_v18 = vpack.c.bf16 %v417_v10, %v416_v8  ;;  %v467_v29 = vld [vmem:[%s2803_s1 + $0x508] sm:$0xff]  ;;  %v484_v37 = vld [vmem:[%s2803_s1 + $0x590] sm:$0xff] }
  0xb7   : > { %1658 = vmatprep.subr.bf16.mxu1 %v1657_v0  ;;  %v432_v0 = vld [vmem:[%s2803_s1 + $0x3f0] sm:$0xff]  ;;  %v1713_v27 = vpack.c.bf16 %v483_v13, %v482_v12  ;;  %v466_v28 = vld [vmem:[%s2803_s1 + $0x500] sm:$0xff]  ;;  %v437_v24 = vld [vmem:[%s2803_s1 + $0x418] sm:$0xff] }
  0xb8   : > { %1628 = vmatpush3.bf16.msra.mxu0 %v1627_v3  ;;  %v1645_v3 = vpack.c.bf16 %v401_v56, %v400_v55  ;;  %v2404_v19 = vrot.slane %v304_v2, %v2155_v61  ;;  %v436_v63 = vld [vmem:[%s2803_s1 + $0x410] sm:$0xff]  ;;  %v1715_v33 = vpack.c.bf16 %v467_v29, %v466_v28  ;;  %v455_v35 = vld [vmem:[%s2803_s1 + $0x4a8] sm:$0xff]  ;;  %v469_v31 = vld [vmem:[%s2803_s1 + $0x518] sm:$0xff] }
  0xb9   : > { %1630 = vmatprep.subr.bf16.mxu0 %v1629_v25  ;;  %v1675_v25 = vpack.c.bf16 %v415_v59, %v414_v58  ;;  %v487_v39 = vld [vmem:[%s2803_s1 + $0x5a8] sm:$0xff]  ;;  %v438_v44 = vld [vmem:[%s2803_s1 + $0x420] sm:$0xff]  ;;  %v456_v47 = vld [vmem:[%s2803_s1 + $0x4b0] sm:$0xff] }
  0xba   : > { %1660 = vmatpush3.bf16.msra.mxu1 %v1659_v7  ;;  %v1677_v7 = vpack.c.bf16 %v433_v1, %v432_v0  ;;  %v439_v46 = vld [vmem:[%s2803_s1 + $0x428] sm:$0xff]  ;;  %v489_v55 = vld [vmem:[%s2803_s1 + $0x5b8] sm:$0xff]  ;;  %v442_v6 = vld [vmem:[%s2803_s1 + $0x440] sm:$0xff] }
  0xbb   : > { %1662 = vmatprep.subr.bf16.mxu1 %v1661_v11  ;;  %v1647_v11 = vpack.c.bf16 %v385_v4, %v384_v53  ;;  %v471_v54 = vld [vmem:[%s2803_s1 + $0x528] sm:$0xff]  ;;  %v1691_v41 = vpack.c.bf16 %v439_v46, %v438_v44  ;;  %v441_v58 = vld [vmem:[%s2803_s1 + $0x438] sm:$0xff]  ;;  %v490_v4 = vld [vmem:[%s2803_s1 + $0x5c0] sm:$0xff] }
  0xbc   : > { %1632 = vmatpush3.bf16.msra.mxu0 %v1631_v14  ;;  %v607_v14 = vcombine.high %v304_v2, %v304_v2  ;;  %v459_v0 = vld [vmem:[%s2803_s1 + $0x4c8] sm:$0xff]  ;;  %v472_v2 = vld [vmem:[%s2803_s1 + $0x530] sm:$0xff]  ;;  %v474_v13 = vld [vmem:[%s2803_s1 + $0x540] sm:$0xff] }
  0xbd   : > { %1634 = vmatprep.subr.bf16.mxu0 %v1633_v17  ;;  %v435_v17 = vld [vmem:[%s2803_s1 + $0x408] sm:$0xff]  ;;  %v460_v10 = vld [vmem:[%s2803_s1 + $0x4d0] sm:$0xff]  ;;  %v462_v28 = vld [vmem:[%s2803_s1 + $0x4e0] sm:$0xff] }
  0xbe   : > { %1664 = vmatpush3.bf16.msra.mxu1 %v1663_v22  ;;  %v452_v22 = vld [vmem:[%s2803_s1 + $0x490] sm:$0xff]  ;;  %v2419_v45 = vrot.slane %v607_v14, %v2155_v61  ;;  %v622_v61 = vcombine.high %v2404_v19, %v2404_v19  ;;  %v475_v14 = vld [vmem:[%s2803_s1 + $0x548] sm:$0xff] }
  0xbf   : > { %1666 = vmatprep.subr.bf16.mxu1 %v1665_v32  ;;  %v1683_v32 = vpack.c.bf16 %v435_v17, %v434_v16  ;;  %v1685_v49 = vpack.c.bf16 %v453_v23, %v452_v22  ;;  %v492_v16 = vld [vmem:[%s2803_s1 + $0x5d0] sm:$0xff]  ;;  %v493_v17 = vld [vmem:[%s2803_s1 + $0x5d8] sm:$0xff]  ;;  %v463_v29 = vld [vmem:[%s2803_s1 + $0x4e8] sm:$0xff] }
  0xc0   : > { %1636 = vmatpush3.bf16.msra.mxu0 %v1635_v36  ;;  %v485_v36 = vld [vmem:[%s2803_s1 + $0x598] sm:$0xff]  ;;  %v623_v26 = vcombine.high %v2419_v45, %v2419_v45  ;;  %v444_v22 = vld [vmem:[%s2803_s1 + $0x450] sm:$0xff] }
  0xc1   : > { %1638 = vmatprep.subr.bf16.mxu0 %v1637_v34  ;;  %v454_v34 = vld [vmem:[%s2803_s1 + $0x4a0] sm:$0xff]  ;;  %v1717_v38 = vpack.c.bf16 %v485_v36, %v484_v37  ;;  %v445_v23 = vld [vmem:[%s2803_s1 + $0x458] sm:$0xff]  ;;  %v476_v37 = vld [vmem:[%s2803_s1 + $0x550] sm:$0xff] }
  0xc2   : > { %1668 = vmatpush3.bf16.msra.mxu1 %v1667_v48  ;;  %v468_v48 = vld [vmem:[%s2803_s1 + $0x510] sm:$0xff]  ;;  %v1689_v43 = vpack.c.bf16 %v455_v35, %v454_v34  ;;  %v477_v36 = vld [vmem:[%s2803_s1 + $0x558] sm:$0xff]  ;;  %v447_v34 = vld [vmem:[%s2803_s1 + $0x468] sm:$0xff] }
  0xc3   : > { %1670 = vmatprep.subr.bf16.mxu1 %v1669_v30  ;;  %v1687_v30 = vpack.c.bf16 %v437_v24, %v436_v63  ;;  %v494_v63 = vld [vmem:[%s2803_s1 + $0x5e0] sm:$0xff]  ;;  %v495_v24 = vld [vmem:[%s2803_s1 + $0x5e8] sm:$0xff]  ;;  %v1735_v35 = vpack.c.bf16 %v477_v36, %v476_v37  ;;  %v448_v46 = vld [vmem:[%s2803_s1 + $0x470] sm:$0xff] }
  0xc4   : > { %1640 = vmatpush3.bf16.msra.mxu0 %v1639_v42  ;;  %v1719_v42 = vpack.c.bf16 %v469_v31, %v468_v48  ;;  %v465_v48 = vld [vmem:[%s2803_s1 + $0x4f8] sm:$0xff]  ;;  %v1737_v31 = vpack.c.bf16 %v495_v24, %v494_v63  ;;  %v534_v36 = vld [vmem:[%s2803_s1 + $0x720] sm:$0xff]  ;;  %v552_v24 = vld [vmem:[%s2803_s1 + $0x7b0] sm:$0xff] }
  0xc5   : > { %1642 = vmatprep.subr.bf16.mxu0 %v1641_v51  ;;  %v470_v51 = vld [vmem:[%s2803_s1 + $0x520] sm:$0xff] }
  0xc6   : > { %1672 = vmatpush3.bf16.msra.mxu1 %v1671_v21  ;;  %v488_v21 = vld [vmem:[%s2803_s1 + $0x5b0] sm:$0xff]  ;;  %v1723_v59 = vpack.c.bf16 %v471_v54, %v470_v51 }
  0xc7   : > { %1674 = vmatprep.subr.bf16.mxu1 %v1673_v57  ;;  %v440_v57 = vld [vmem:[%s2803_s1 + $0x430] sm:$0xff]  ;;  %v1725_v1 = vpack.c.bf16 %v489_v55, %v488_v21  ;;  %v546_v55 = vld [vmem:[%s2803_s1 + $0x780] sm:$0xff] }
  0xc8   : > { %1644 = vmatpush3.bf16.msra.mxu0 %v1643_v62  ;;  %v458_v62 = vld [vmem:[%s2803_s1 + $0x4c0] sm:$0xff]  ;;  %v1695_v53 = vpack.c.bf16 %v441_v58, %v440_v57  ;;  %v480_v54 = vld [vmem:[%s2803_s1 + $0x570] sm:$0xff] }
  0xc9   : > { %1646 = vmatprep.subr.bf16.mxu0 %v1645_v3  ;;  %v473_v3 = vld [vmem:[%s2803_s1 + $0x538] sm:$0xff]  ;;  %v1697_v5 = vpack.c.bf16 %v459_v0, %v458_v62  ;;  %v498_v58 = vld [vmem:[%s2803_s1 + $0x600] sm:$0xff]  ;;  %v516_v0 = vld [vmem:[%s2803_s1 + $0x690] sm:$0xff] }
  0xca   : > { %1676 = vmatpush3.bf16.msra.mxu1 %v1675_v25  ;;  %v491_v25 = vld [vmem:[%s2803_s1 + $0x5c8] sm:$0xff]  ;;  %v1727_v8 = vpack.c.bf16 %v473_v3, %v472_v2  ;;  %v530_v3 = vld [vmem:[%s2803_s1 + $0x700] sm:$0xff] }
  0xcb   : > { %1678 = vmatprep.subr.bf16.mxu1 %v1677_v7  ;;  %v443_v7 = vld [vmem:[%s2803_s1 + $0x448] sm:$0xff]  ;;  %v1729_v12 = vpack.c.bf16 %v491_v25, %v490_v4  ;;  %v548_v25 = vld [vmem:[%s2803_s1 + $0x790] sm:$0xff] }
  0xcc   : > { %1648 = vmatpush3.bf16.msra.mxu0 %v1647_v11  ;;  %v461_v11 = vld [vmem:[%s2803_s1 + $0x4d8] sm:$0xff] }
  0xcd   : > { %1682 = vmatprep.subr.bf16.mxu0 %v1681_v15  ;;  %v1699_v15 = vpack.c.bf16 %v443_v7, %v442_v6  ;;  %v500_v7 = vld [vmem:[%s2803_s1 + $0x610] sm:$0xff] }
  0xce   : > { %1680 = vmatpush3.bf16.msra.mxu1 %v1679_v18  ;;  %v1701_v18 = vpack.c.bf16 %v461_v11, %v460_v10  ;;  %v639_v10 = vcombine.high %v2244_v60, %v2244_v60 }
  0xcf   : > { %862 = vmatmul.mubr.f32.vlgmr.msra.gmra.mrb[2].mxu0 %v2173_v9  ;;  %1714 = vmatprep.subr.bf16.mxu1 %v1713_v27  ;;  %v486_v9 = vld [vmem:[%s2803_s1 + $0x5a0] sm:$0xff]  ;;  %v1731_v27 = vpack.c.bf16 %v475_v14, %v474_v13  ;;  %v519_v13 = vld [vmem:[%s2803_s1 + $0x6a8] sm:$0xff] }
  0xd0   : > { %1684 = vmatpush3.bf16.msra.mxu0 %v1683_v32  ;;  %1001 = vmatprep.mubr.f32.mxu0 %v622_v61  ;;  %v1721_v50 = vpack.c.bf16 %v487_v39, %v486_v9  ;;  %v1733_v32 = vpack.c.bf16 %v493_v17, %v492_v16  ;;  %v1705_v61 = vpack.c.bf16 %v463_v29, %v462_v28  ;;  %v496_v39 = vld [vmem:[%s2803_s1 + $0x5f0] sm:$0xff]  ;;  %v533_v16 = vld [vmem:[%s2803_s1 + $0x718] sm:$0xff]  ;;  %v503_v28 = vld [vmem:[%s2803_s1 + $0x628] sm:$0xff] }
  0xd1   : > { %932 = vmatmul.mubr.f32.vlgmr.msra.gmra.mrb[2].mxu1 %v2197_v20  ;;  %1686 = vmatprep.subr.bf16.mxu0 %v1685_v49  ;;  %v457_v20 = vld [vmem:[%s2803_s1 + $0x4b8] sm:$0xff]  ;;  %v1703_v49 = vpack.c.bf16 %v445_v23, %v444_v22  ;;  %v640_v17 = vcombine.high %v2259_v52, %v2259_v52  ;;  %v551_v22 = vld [vmem:[%s2803_s1 + $0x7a8] sm:$0xff] }
  0xd2   : > { %1716 = vmatpush3.bf16.msra.mxu1 %v1715_v33  ;;  %1071 = vmatprep.mubr.f32.mxu1 %v623_v26  ;;  %v1693_v56 = vpack.c.bf16 %v457_v20, %v456_v47  ;;  %v446_v33 = vld [vmem:[%s2803_s1 + $0x460] sm:$0xff] }
  0xd3   : > { %1718 = vmatprep.subr.bf16.mxu1 %v1717_v38  ;;  %v464_v38 = vld [vmem:[%s2803_s1 + $0x4f0] sm:$0xff]  ;;  %v478_v26 = vld [vmem:[%s2803_s1 + $0x560] sm:$0xff]  ;;  %v1707_v9 = vpack.c.bf16 %v447_v34, %v446_v33 }
  0xd4   : > { %1688 = vmatpush3.bf16.msra.mxu0 %v1687_v30  ;;  %v479_v30 = vld [vmem:[%s2803_s1 + $0x568] sm:$0xff]  ;;  %v1709_v44 = vpack.c.bf16 %v465_v48, %v464_v38  ;;  %v514_v20 = vld [vmem:[%s2803_s1 + $0x680] sm:$0xff]  ;;  %v504_v34 = vld [vmem:[%s2803_s1 + $0x630] sm:$0xff] }
  0xd5   : > { %1690 = vmatprep.subr.bf16.mxu0 %v1689_v43  ;;  %v497_v43 = vld [vmem:[%s2803_s1 + $0x5f8] sm:$0xff]  ;;  %v1739_v47 = vpack.c.bf16 %v479_v30, %v478_v26  ;;  %v522_v48 = vld [vmem:[%s2803_s1 + $0x6c0] sm:$0xff]  ;;  %v536_v30 = vld [vmem:[%s2803_s1 + $0x730] sm:$0xff] }
  0xd6   : > { %1720 = vmatpush3.bf16.msra.mxu1 %v1719_v42  ;;  %v449_v42 = vld [vmem:[%s2803_s1 + $0x478] sm:$0xff]  ;;  %v1741_v51 = vpack.c.bf16 %v497_v43, %v496_v39  ;;  %v554_v43 = vld [vmem:[%s2803_s1 + $0x7c0] sm:$0xff] }
  0xd7   : > { %1722 = vmatprep.subr.bf16.mxu1 %v1721_v50  ;;  %v515_v50 = vld [vmem:[%s2803_s1 + $0x688] sm:$0xff]  ;;  %v1711_v21 = vpack.c.bf16 %v449_v42, %v448_v46  ;;  %v506_v42 = vld [vmem:[%s2803_s1 + $0x640] sm:$0xff] }
  0xd8   : > { %1692 = vmatpush3.bf16.msra.mxu0 %v1691_v41  ;;  %v481_v41 = vld [vmem:[%s2803_s1 + $0x578] sm:$0xff]  ;;  %v1745_v57 = vpack.c.bf16 %v515_v50, %v514_v20  ;;  %v524_v50 = vld [vmem:[%s2803_s1 + $0x6d0] sm:$0xff] }
  0xd9   : > { %1694 = vmatprep.subr.bf16.mxu0 %v1693_v56  ;;  %v547_v56 = vld [vmem:[%s2803_s1 + $0x788] sm:$0xff]  ;;  %v1743_v62 = vpack.c.bf16 %v481_v41, %v480_v54  ;;  %v538_v41 = vld [vmem:[%s2803_s1 + $0x740] sm:$0xff] }
  0xda   : > { %1724 = vmatpush3.bf16.msra.mxu1 %v1723_v59  ;;  %v499_v59 = vld [vmem:[%s2803_s1 + $0x608] sm:$0xff]  ;;  %v1777_v2 = vpack.c.bf16 %v547_v56, %v546_v55  ;;  %v556_v56 = vld [vmem:[%s2803_s1 + $0x7d0] sm:$0xff] }
  0xdb   : > { %1726 = vmatprep.subr.bf16.mxu1 %v1725_v1  ;;  %v517_v1 = vld [vmem:[%s2803_s1 + $0x698] sm:$0xff]  ;;  %v1747_v4 = vpack.c.bf16 %v499_v59, %v498_v58  ;;  %v508_v59 = vld [vmem:[%s2803_s1 + $0x650] sm:$0xff] }
  0xdc   : > { %1696 = vmatpush3.bf16.msra.mxu0 %v1695_v53  ;;  %v531_v53 = vld [vmem:[%s2803_s1 + $0x708] sm:$0xff]  ;;  %v1749_v6 = vpack.c.bf16 %v517_v1, %v516_v0  ;;  %v526_v1 = vld [vmem:[%s2803_s1 + $0x6e0] sm:$0xff] }
  0xdd   : > { %1698 = vmatprep.subr.bf16.mxu0 %v1697_v5  ;;  %v549_v5 = vld [vmem:[%s2803_s1 + $0x798] sm:$0xff]  ;;  %v1779_v11 = vpack.c.bf16 %v531_v53, %v530_v3  ;;  %v540_v53 = vld [vmem:[%s2803_s1 + $0x750] sm:$0xff] }
  0xde   : > { %1728 = vmatpush3.bf16.msra.mxu1 %v1727_v8  ;;  %v501_v8 = vld [vmem:[%s2803_s1 + $0x618] sm:$0xff]  ;;  %v1781_v14 = vpack.c.bf16 %v549_v5, %v548_v25  ;;  %v558_v5 = vld [vmem:[%s2803_s1 + $0x7e0] sm:$0xff] }
  0xdf   : > { %1730 = vmatprep.subr.bf16.mxu1 %v1729_v12  ;;  %v518_v12 = vld [vmem:[%s2803_s1 + $0x6a0] sm:$0xff] }
  0xe0   : > { %1700 = vmatpush3.bf16.msra.mxu0 %v1699_v15  ;;  %v532_v15 = vld [vmem:[%s2803_s1 + $0x710] sm:$0xff]  ;;  %v1753_v23 = vpack.c.bf16 %v519_v13, %v518_v12  ;;  %v529_v13 = vld [vmem:[%s2803_s1 + $0x6f8] sm:$0xff] }
  0xe1   : > { %1702 = vmatprep.subr.bf16.mxu0 %v1701_v18  ;;  %v1751_v18 = vpack.c.bf16 %v501_v8, %v500_v7  ;;  %v1783_v29 = vpack.c.bf16 %v533_v16, %v532_v15  ;;  %v510_v8 = vld [vmem:[%s2803_s1 + $0x660] sm:$0xff]  ;;  %v528_v12 = vld [vmem:[%s2803_s1 + $0x6f0] sm:$0xff]  ;;  %v543_v16 = vld [vmem:[%s2803_s1 + $0x768] sm:$0xff] }
  0xe2   : > { %1732 = vmatpush3.bf16.msra.mxu1 %v1731_v27  ;;  %v502_v27 = vld [vmem:[%s2803_s1 + $0x620] sm:$0xff] }
  0xe3   : > { %1734 = vmatprep.subr.bf16.mxu1 %v1733_v32  ;;  %v520_v32 = vld [vmem:[%s2803_s1 + $0x6b0] sm:$0xff]  ;;  %v1755_v63 = vpack.c.bf16 %v503_v28, %v502_v27  ;;  %v542_v15 = vld [vmem:[%s2803_s1 + $0x760] sm:$0xff]  ;;  %v513_v27 = vld [vmem:[%s2803_s1 + $0x678] sm:$0xff] }
  0xe4   : > { %1704 = vmatpush3.bf16.msra.mxu0 %v1703_v49  ;;  %v535_v49 = vld [vmem:[%s2803_s1 + $0x728] sm:$0xff]  ;;  %v1803_v28 = vpack.c.bf16 %v543_v16, %v542_v15 }
  0xe5   : > { %1706 = vmatprep.subr.bf16.mxu0 %v1705_v61  ;;  %v553_v61 = vld [vmem:[%s2803_s1 + $0x7b8] sm:$0xff]  ;;  %v1787_v38 = vpack.c.bf16 %v535_v49, %v534_v36 }
  0xe6   : > { %1736 = vmatpush3.bf16.msra.mxu1 %v1735_v35  ;;  %v505_v35 = vld [vmem:[%s2803_s1 + $0x638] sm:$0xff]  ;;  %v1789_v26 = vpack.c.bf16 %v553_v61, %v552_v24 }
  0xe7   : > { %1738 = vmatprep.subr.bf16.mxu1 %v1737_v31  ;;  %v523_v31 = vld [vmem:[%s2803_s1 + $0x6c8] sm:$0xff]  ;;  %v1759_v39 = vpack.c.bf16 %v505_v35, %v504_v34 }
  0xe8   : > { %1708 = vmatpush3.bf16.msra.mxu0 %v1707_v9  ;;  %v537_v9 = vld [vmem:[%s2803_s1 + $0x738] sm:$0xff]  ;;  %v1761_v46 = vpack.c.bf16 %v523_v31, %v522_v48 }
  0xe9   : > { %1710 = vmatprep.subr.bf16.mxu0 %v1709_v44  ;;  %v555_v44 = vld [vmem:[%s2803_s1 + $0x7c8] sm:$0xff]  ;;  %v1791_v20 = vpack.c.bf16 %v537_v9, %v536_v30 }
  0xea   : > { %1740 = vmatpush3.bf16.msra.mxu1 %v1739_v47  ;;  %v507_v47 = vld [vmem:[%s2803_s1 + $0x648] sm:$0xff]  ;;  %v1793_v54 = vpack.c.bf16 %v555_v44, %v554_v43 }
  0xeb   : > { %1742 = vmatprep.subr.bf16.mxu1 %v1741_v51  ;;  %v525_v51 = vld [vmem:[%s2803_s1 + $0x6d8] sm:$0xff]  ;;  %v1763_v55 = vpack.c.bf16 %v507_v47, %v506_v42 }
  0xec   : > { %1712 = vmatpush3.bf16.msra.mxu0 %v1711_v21  ;;  %v539_v21 = vld [vmem:[%s2803_s1 + $0x748] sm:$0xff]  ;;  %v1765_v58 = vpack.c.bf16 %v525_v51, %v524_v50 }
  0xed   : > { %1746 = vmatprep.subr.bf16.mxu0 %v1745_v57  ;;  %v557_v57 = vld [vmem:[%s2803_s1 + $0x7d8] sm:$0xff]  ;;  %v1795_v0 = vpack.c.bf16 %v539_v21, %v538_v41 }
  0xee   : > { %1744 = vmatpush3.bf16.msra.mxu1 %v1743_v62  ;;  %v509_v62 = vld [vmem:[%s2803_s1 + $0x658] sm:$0xff]  ;;  %v1797_v3 = vpack.c.bf16 %v557_v57, %v556_v56 }
  0xef   : > { %1002 = vmatmul.mubr.f32.vlgmr.msra.gmra.mrb[4].mxu0 %v2404_v19  ;;  %1778 = vmatprep.subr.bf16.mxu1 %v1777_v2  ;;  %v550_v19 = vld [vmem:[%s2803_s1 + $0x7a0] sm:$0xff]  ;;  %v527_v2 = vld [vmem:[%s2803_s1 + $0x6e8] sm:$0xff]  ;;  %v1767_v25 = vpack.c.bf16 %v509_v62, %v508_v59 }
  0xf0   : > { %1748 = vmatpush3.bf16.msra.mxu0 %v1747_v4  ;;  %1141 = vmatprep.mubr.f32.mxu0 %v639_v10  ;;  %v1785_v37 = vpack.c.bf16 %v551_v22, %v550_v19  ;;  %v541_v4 = vld [vmem:[%s2803_s1 + $0x758] sm:$0xff]  ;;  %v1769_v7 = vpack.c.bf16 %v527_v2, %v526_v1  ;;  %v511_v10 = vld [vmem:[%s2803_s1 + $0x668] sm:$0xff]  ;;  %v1773_v22 = vpack.c.bf16 %v529_v13, %v528_v12  ;;  %v1217_v62 = vld [vmem:[#allocation3] sm:$0x3] }
  0xf1   : > { %1072 = vmatmul.mubr.f32.vlgmr.msra.gmra.mrb[4].mxu1 %v2419_v45  ;;  %1750 = vmatprep.subr.bf16.mxu0 %v1749_v6  ;;  %v521_v45 = vld [vmem:[%s2803_s1 + $0x6b8] sm:$0xff]  ;;  %v559_v6 = vld [vmem:[%s2803_s1 + $0x7e8] sm:$0xff] }
  0xf2   : > { %1780 = vmatpush3.bf16.msra.mxu1 %v1779_v11  ;;  %1211 = vmatprep.mubr.f32.mxu1 %v640_v17  ;;  %v1757_v33 = vpack.c.bf16 %v521_v45, %v520_v32  ;;  %v1799_v11 = vpack.c.bf16 %v541_v4, %v540_v53  ;;  %v1771_v17 = vpack.c.bf16 %v511_v10, %v510_v8  ;;  %v561_v19 = vld [vmem:[%s2803_s1 + $0x7f8] sm:$0xff]  ;;  %v544_v32 = vld [vmem:[%s2803_s1 + $0x770] sm:$0xff]  ;;  %v1224_v53 = vld [vmem:[%s2805_s3] sm:$0x3] }
  0xf3   : > { %1782 = vmatprep.subr.bf16.mxu1 %v1781_v14  ;;  %v1801_v14 = vpack.c.bf16 %v559_v6, %v558_v5  ;;  %v545_v45 = vld [vmem:[%s2803_s1 + $0x778] sm:$0xff] }
  0xf4   : > { %1752 = vmatpush3.bf16.msra.mxu0 %v1751_v18  ;;  %v560_v18 = vld [vmem:[%s2803_s1 + $0x7f0] sm:$0xff]  ;;  %v1807_v36 = vpack.c.bf16 %v545_v45, %v544_v32 }
  0xf5   : > { %1754 = vmatprep.subr.bf16.mxu0 %v1753_v23  ;;  %v512_v23 = vld [vmem:[%s2803_s1 + $0x670] sm:$0xff] }
  0xf6   : > { %1784 = vmatpush3.bf16.msra.mxu1 %v1783_v29  ;;  %v1805_v29 = vpack.c.bf16 %v561_v19, %v560_v18 }
  0xf7   : > { %1786 = vmatprep.subr.bf16.mxu1 %v1785_v37  ;;  %v1775_v37 = vpack.c.bf16 %v513_v27, %v512_v23 }
  0xf8   : > { %1756 = vmatpush3.bf16.msra.mxu0 %v1755_v63  ;;  %v1268_v63 = vld [vmem:[%s2804_s2] ss:$0 sm:$0xff] }
  0xf9   : > { %1758 = vmatprep.subr.bf16.mxu0 %v1757_v33 }
  0xfa   : > { %1788 = vmatpush3.bf16.msra.mxu1 %v1787_v38 }
  0xfb   : > { %1790 = vmatprep.subr.bf16.mxu1 %v1789_v26 }
  0xfc   : > { %1760 = vmatpush3.bf16.msra.mxu0 %v1759_v39 }
  0xfd   : > { %1762 = vmatprep.subr.bf16.mxu0 %v1761_v46 }
  0xfe   : > { %1792 = vmatpush3.bf16.msra.mxu1 %v1791_v20 }
  0xff   : > { %1794 = vmatprep.subr.bf16.mxu1 %v1793_v54 }
 0x100   : > { %1764 = vmatpush3.bf16.msra.mxu0 %v1763_v55 }
 0x101   : > { %1766 = vmatprep.subr.bf16.mxu0 %v1765_v58 }
 0x102   : > { %1796 = vmatpush3.bf16.msra.mxu1 %v1795_v0 }
 0x103   : > { %1798 = vmatprep.subr.bf16.mxu1 %v1797_v3 }
 0x104   : > { %1768 = vmatpush3.bf16.msra.mxu0 %v1767_v25 }
 0x105   : > { %1770 = vmatprep.subr.bf16.mxu0 %v1769_v7 }
 0x106   : > { %1800 = vmatpush3.bf16.msra.mxu1 %v1799_v11 }
 0x107   : > { %1802 = vmatprep.subr.bf16.mxu1 %v1801_v14 }
 0x108   : > { %1772 = vmatpush3.bf16.msra.mxu0 %v1771_v17 }
 0x109   : > { %1774 = vmatprep.subr.bf16.mxu0 %v1773_v22 }
 0x10a   : > { %1804 = vmatpush3.bf16.msra.mxu1 %v1803_v28 }
 0x10b   : > { %1806 = vmatprep.subr.bf16.mxu1 %v1805_v29 }
 0x10c   : > { %1776 = vmatpush3.bf16.msra.mxu0 %v1775_v37 }
 0x10e   : > { %1808 = vmatpush3.bf16.msra.mxu1 %v1807_v36 }
 0x10f   : > { %1142 = vmatmul.mubr.f32.vlgmr.msra.gmra.mrb[6].mxu0 %v2244_v60 }
 0x111   : > { %1212 = vmatmul.mubr.f32.vlgmr.msra.gmra.mrb[6].mxu1 %v2259_v52 }
 0x182   : > { %v1305_v49 = vpop.f32.mrb[0].mxu0 }
 0x183   : > { %v1306_v24 = vpop.f32.mrb[1].mxu0 }
 0x184   : > { %v1307_v61 = vadd.f32 %v1306_v24, %v1305_v49  ;;  %v1340_v33 = vpop.f32.mrb[0].mxu1 }
 0x185   : > { %v1341_v34 = vpop.f32.mrb[1].mxu1 }
 0x186   : > { %v724_v35 = vadd.f32 %v1307_v61, %v1268_v63  ;;  %v1342_v38 = vadd.f32 %v1341_v34, %v1340_v33 }
 0x188   : > { %v794_v48 = vadd.f32 %v1342_v38, %v724_v35 }
 0x1a2   : > { %v1375_v31 = vpop.f32.mrb[2].mxu0 }
 0x1a3   : > { %v1376_v26 = vpop.f32.mrb[3].mxu0 }
 0x1a4   : > { %v1377_v30 = vadd.f32 %v1376_v26, %v1375_v31  ;;  %v1410_v9 = vpop.f32.mrb[2].mxu1 }
 0x1a5   : > { %v1411_v39 = vpop.f32.mrb[3].mxu1 }
 0x1a6   : > { %v864_v60 = vadd.f32 %v1377_v30, %v794_v48  ;;  %v1412_v43 = vadd.f32 %v1411_v39, %v1410_v9 }
 0x1a8   : > { %v934_v52 = vadd.f32 %v1412_v43, %v864_v60 }
 0x1c2   : > { %v1445_v44 = vpop.f32.mrb[4].mxu0 }
 0x1c3   : > { %v1446_v46 = vpop.f32.mrb[5].mxu0 }
 0x1c4   : > { %v1447_v42 = vadd.f32 %v1446_v46, %v1445_v44  ;;  %v1480_v47 = vpop.f32.mrb[4].mxu1 }
 0x1c5   : > { %v1481_v20 = vpop.f32.mrb[5].mxu1 }
 0x1c6   : > { %v1004_v50 = vadd.f32 %v1447_v42, %v934_v52  ;;  %v1482_v51 = vadd.f32 %v1481_v20, %v1480_v47 }
 0x1c8   : > { %v1074_v54 = vadd.f32 %v1482_v51, %v1004_v50 }
 0x1e2   : > { %v1515_v41 = vpop.f32.mrb[6].mxu0 }
 0x1e3   : > { %v1516_v21 = vpop.f32.mrb[7].mxu0 }
 0x1e4   : > { %v1517_v55 = vadd.f32 %v1516_v21, %v1515_v41  ;;  %v1550_v56 = vpop.f32.mrb[6].mxu1 }
 0x1e5   : > { %v1551_v57 = vpop.f32.mrb[7].mxu1 }
 0x1e6   : > { %v1144_v58 = vadd.f32 %v1517_v55, %v1074_v54  ;;  %v1552_v59 = vadd.f32 %v1551_v57, %v1550_v56 }
 0x1e8   : > { %v1214_v0 = vadd.f32 %v1552_v59, %v1144_v58 }
 0x1ea   : > { %v1218_v1 = vsub.f32 %v1214_v0, %v1217_v62 }
 0x1ec   : > { %v1219_v2 = vmul.f32 0.5, %v1218_v1 }
 0x1ee   : > { %v1220_v3 = vadd.f32 %v1219_v2, %v1217_v62 }
 0x1f0   : > { %vm1221_vm9 = vcmp.ge.f32.partialorder %v1220_v3, 1.0 }
 0x1f1   : > { %v1222_v4 = vsel %vm1221_vm9, 0.0, %v1220_v3  ;;  %v1269_v25 = vsel %vm1221_vm9, 1.0, %v1845_v40 }
 0x1f2   : > { %1223 = vst [vmem:[#allocation3] sm:$0x3] %v1222_v4  ;;  %v1227_v5 = vadd.f32 %v1269_v25, %v1224_v53 }
 0x1f4   : > { %1228 = vst [vmem:[%s2805_s3] sm:$0x3] %v1227_v5 }
 0x1f5 PF: > { %s13_s12 = sadd.s32 1, %s1842_s12  }
 0x1f6   : > { %p10_p5 = scmp.ge.s32.totalorder %s13_s12, 10  }
 0x1f8   :  { %12 = sbr.rel (!%p10_p5) target bundleno = 1 (0x1), region = 62 }

</bundles_post_ra>
